<compile_context>
chip_gen: v7x
topology: tpu7x:2x2x1
jax: 0.10.0
libtpu: 0.0.40
codegen_flags: <defaults>
</compile_context>

<pallas_src>
import jax
import jax.numpy as jnp
from jax.experimental import pallas as pl
from jax.experimental.pallas import tpu as pltpu


# ---------------------------------------------------------------------------
# Fused kernel
# ---------------------------------------------------------------------------
def _fused_forward_kernel(p_ref, w12_ref, b12_ref, w3_ref, b3_ref,
                          g_ref, be_ref,
                          c12_ref, v_ref, ab_ref):
    f32 = jnp.float32
    bf16 = jnp.bfloat16

    # ---- conv1 + conv2 as one im2col matmul --------------------------------
    # p_ref : (144, 147) bf16   rows = z flat index r, cols = (kh*7+kw)*3 + ci
    # w12   : (147, 192) bf16   cols 0..63 = conv1, 64..191 = conv2 (6x6 zero
    #                           padded into the 7x7 tap frame)
    c12 = jnp.dot(p_ref[...], w12_ref[...],
                  preferred_element_type=f32) + b12_ref[...]          # (144,192)
    c12_ref[...] = c12

    # ---- v = ConstantPad2d((3,3,2,2), 2.0)(y) built as a value --------------
    # y rows sit at slab rows 35 + 16*ho + wo (ho,wo in 0..3), cols 0..63.
    pad20 = jnp.full((20, 64), 2.0, f32)
    pad3 = jnp.full((3, 64), 2.0, f32)
    pieces = [pad20]
    for ho in range(4):
        pieces.append(pad3)
        pieces.append(c12_ref[35 + 16 * ho: 39 + 16 * ho, 0:64])      # (4, 64)
        pieces.append(pad3)
    pieces.append(pad20)
    v_val = jnp.concatenate(pieces, axis=0)                           # (80, 64) f32
    v_ref[...] = v_val
    v2 = v_val.astype(bf16)

    # ---- conv1b: 64 -> 64, k=7 on v (8x10) -> u (2,4,64) --------------------
    # Group the 7 kw taps of each kh along the contraction (K = 448):
    #   v_wide[r, kw*64 + c] = v2[r + kw, c]
    v_wide = jnp.concatenate([v2[t:t + 74, :] for t in range(7)],
                             axis=1)                                  # (74, 448) bf16
    acc = jnp.zeros((14, 64), f32)
    for kh in range(7):
        lhs = v_wide[kh * 10: kh * 10 + 14, :]                        # (14, 448)
        wt = w3_ref[kh * 448: (kh + 1) * 448, :]                      # (448, 64) ref slice
        acc = acc + jnp.dot(lhs, wt, preferred_element_type=f32)
    # valid output rows are slab rows {0..3, 10..13}
    u = jnp.concatenate([acc[0:4, :], acc[10:14, :]], axis=0) + b3_ref[...]   # (8, 64)

    # ---- BatchNorm (training-mode batch stats, two-pass variance) + tanh ----
    mean = jnp.sum(u, axis=0, keepdims=True) * 0.125
    d = u - mean
    var = jnp.sum(d * d, axis=0, keepdims=True) * 0.125
    a = d * jax.lax.rsqrt(var + 1e-5) * g_ref[...] + be_ref[...]      # (8, 64)
    ab_ref[...] = jnp.concatenate([a, jnp.tanh(a)], axis=1)           # (8, 128)


# ---------------------------------------------------------------------------
# Wrappers
# ---------------------------------------------------------------------------
def _full_spec(shape):
    nd = len(shape)
    return pl.BlockSpec(tuple(shape), lambda *_, nd=nd: (0,) * nd)


def prepare_params(params):
    """One-time repack of PyTorch-layout conv weights into MXU-friendly
    (KH*KW*Cin, Cout) bf16 matrices (row order = (kh, kw, cin)); conv2's 6x6
    kernel is zero-padded into the 7x7 tap frame and concatenated with conv1
    along Cout so both convs share one patch matrix."""
    f32, bf16 = jnp.float32, jnp.bfloat16

    def wmat(w):  # (Cout, Cin, KH, KW) -> (7*7*Cin, Cout) bf16, zero-pad to 7x7
        co, ci, kh, kw = w.shape
        wp = jnp.pad(w, ((0, 0), (0, 0), (0, 7 - kh), (0, 7 - kw)))
        return jnp.transpose(wp, (2, 3, 1, 0)).reshape(49 * ci, co).astype(bf16)

    w12 = jnp.concatenate([wmat(params["w1"]), wmat(params["w2"])], axis=1)  # (147,192)
    b12 = jnp.concatenate([params["b1"], params["b2"]]).reshape(1, -1).astype(f32)
    return {
        "w12": w12, "b12": b12,
        "w3": wmat(params["w1b"]),                              # (3136, 64)
        "b3": params["b1b"].reshape(1, -1).astype(f32),
        "gamma": params["gamma"].reshape(1, -1).astype(f32),
        "beta": params["beta"].reshape(1, -1).astype(f32),
    }


def model_forward(x3, p):
    f32, bf16 = jnp.float32, jnp.bfloat16

    # NCHW -> HWC (N=1); pad once (z is both a model output and the im2col source).
    x = jnp.transpose(x3[0], (1, 2, 0))                                # (10,10,3)
    z = jnp.pad(x, ((2, 2), (3, 3), (0, 0)), constant_values=2.0)      # (14,16,3)

    # im2col patch matrix of z: P[r, (kh*7+kw)*3 + ci] = z_flat[r + kh*16 + kw, ci]
    z2 = jnp.pad(z.reshape(14 * 16, 3), ((0, 22), (0, 0)))             # (246, 3)
    patches = jnp.concatenate(
        [z2[kh * 16 + kw: kh * 16 + kw + 144, :]
         for kh in range(7) for kw in range(7)],
        axis=1).astype(bf16)                                           # (144, 147)

    ins = (patches, p["w12"], p["b12"], p["w3"], p["b3"], p["gamma"], p["beta"])
    out_shape = (
        jax.ShapeDtypeStruct((144, 192), f32),   # fused conv1|conv2 slab
        jax.ShapeDtypeStruct((80, 64), f32),     # v rows (h*10 + w)
        jax.ShapeDtypeStruct((8, 128), f32),     # [a | b] rows (ho*4 + wo)
    )
    c12, v_rows, ab = pl.pallas_call(
        _fused_forward_kernel,
        out_shape=out_shape,
        grid=(1,),
        in_specs=[_full_spec(t.shape) for t in ins],
        out_specs=tuple(_full_spec(s.shape) for s in out_shape),
        compiler_params=pltpu.CompilerParams(
            dimension_semantics=("arbitrary",)),
    )(*ins)

    def to_nchw(hwc):                      # (h, w, c) -> (1, c, h, w)
        return jnp.transpose(hwc, (2, 0, 1))[None]

    slab = c12.reshape(9, 16, 192)
    y = to_nchw(slab[2:6, 3:7, 0:64])          # (1, 64, 4, 4)
    w = to_nchw(slab[0:9, 0:11, 64:192])       # (1, 128, 9, 11)
    v = to_nchw(v_rows.reshape(8, 10, 64))     # (1, 64, 8, 10)
    a = to_nchw(ab[:, 0:64].reshape(2, 4, 64))     # (1, 64, 2, 4)
    b = to_nchw(ab[:, 64:128].reshape(2, 4, 64))   # (1, 64, 2, 4)
    z_out = jnp.transpose(z, (2, 0, 1))[None]      # (1, 3, 14, 16)
    return a, b, y, z_out, v, w


# ---------------------------------------------------------------------------
# Main
# ---------------------------------------------------------------------------
if __name__ == "__main__":
    key = jax.random.PRNGKey(0)
    ks = jax.random.split(key, 7)

    x3 = jax.random.normal(ks[0], (1, 3, 10, 10), jnp.float32)

    params = {
        # conv1: 3 -> 64, k=7 (as declared)
        "w1": jax.random.normal(ks[1], (64, 3, 7, 7), jnp.float32) * 0.1,
        "b1": jax.random.normal(ks[2], (64,), jnp.float32) * 0.1,
        # conv2 applied to 3-ch padded input: 3 -> 128, k=6
        "w2": jax.random.normal(ks[3], (128, 3, 6, 6), jnp.float32) * 0.1,
        "b2": jax.random.normal(ks[4], (128,), jnp.float32) * 0.1,
        # second conv1 application on 64-ch tensor: 64 -> 64, k=7
        "w1b": jax.random.normal(ks[5], (64, 64, 7, 7), jnp.float32) * 0.05,
        "b1b": jax.random.normal(ks[6], (64,), jnp.float32) * 0.1,
        # BatchNorm (64 ch), PyTorch default affine init
        "gamma": jnp.ones((64,), jnp.float32),
        "beta": jnp.zeros((64,), jnp.float32),
    }

    prepped = prepare_params(params)          # one-time weight repack
    outs = jax.jit(model_forward)(x3, prepped)
    outs = jax.block_until_ready(outs)

    expected_shapes = [
        (1, 64, 2, 4),    # a
        (1, 64, 2, 4),    # b
        (1, 64, 4, 4),    # y
        (1, 3, 14, 16),   # z
        (1, 64, 8, 10),   # v
        (1, 128, 9, 11),  # w
    ]
    assert [tuple(o.shape) for o in outs] == expected_shapes, \
        [tuple(o.shape) for o in outs]
    assert all(bool(jnp.all(jnp.isfinite(o))) for o in outs)

    print("KERNEL_OK")
</pallas_src>

<mosaic_0001>
module attributes {stable_mosaic.version = 11 : i64} {
  func.func @_fused_forward_kernel(%arg0: i32, %arg1: memref<144x147xbf16, #tpu.memory_space<vmem>>, %arg2: memref<147x192xbf16, #tpu.memory_space<vmem>>, %arg3: memref<1x192xf32, #tpu.memory_space<vmem>>, %arg4: memref<3136x64xbf16, #tpu.memory_space<vmem>>, %arg5: memref<1x64xf32, #tpu.memory_space<vmem>>, %arg6: memref<1x64xf32, #tpu.memory_space<vmem>>, %arg7: memref<1x64xf32, #tpu.memory_space<vmem>>, %arg8: memref<144x192xf32, #tpu.memory_space<vmem>>, %arg9: memref<80x64xf32, #tpu.memory_space<vmem>>, %arg10: memref<8x128xf32, #tpu.memory_space<vmem>>) attributes {dimension_semantics = [#tpu.dimension_semantics<arbitrary>], iteration_bounds = array<i64: 1>, scalar_prefetch = 0 : i64, scratch_operands = 0 : i64, tpu.core_type = #tpu.core_type<tc>, window_params = [{pipeline_mode = #tpu.pipeline_mode<synchronous>, transform_indices = @transform_0, window_bounds = array<i64: 144, 147>}, {pipeline_mode = #tpu.pipeline_mode<synchronous>, transform_indices = @transform_1, window_bounds = array<i64: 147, 192>}, {pipeline_mode = #tpu.pipeline_mode<synchronous>, transform_indices = @transform_2, window_bounds = array<i64: 1, 192>}, {pipeline_mode = #tpu.pipeline_mode<synchronous>, transform_indices = @transform_3, window_bounds = array<i64: 3136, 64>}, {pipeline_mode = #tpu.pipeline_mode<synchronous>, transform_indices = @transform_4, window_bounds = array<i64: 1, 64>}, {pipeline_mode = #tpu.pipeline_mode<synchronous>, transform_indices = @transform_5, window_bounds = array<i64: 1, 64>}, {pipeline_mode = #tpu.pipeline_mode<synchronous>, transform_indices = @transform_6, window_bounds = array<i64: 1, 64>}, {pipeline_mode = #tpu.pipeline_mode<synchronous>, transform_indices = @transform_7, window_bounds = array<i64: 144, 192>}, {pipeline_mode = #tpu.pipeline_mode<synchronous>, transform_indices = @transform_8, window_bounds = array<i64: 80, 64>}, {pipeline_mode = #tpu.pipeline_mode<synchronous>, transform_indices = @transform_9, window_bounds = array<i64: 8, 128>}]} {
    %c0 = arith.constant 0 : index
    %c0_0 = arith.constant 0 : index
    %0 = vector.load %arg1[%c0, %c0_0] : memref<144x147xbf16, #tpu.memory_space<vmem>>, vector<144x147xbf16>
    %c0_1 = arith.constant 0 : index
    %c0_2 = arith.constant 0 : index
    %1 = vector.load %arg2[%c0_1, %c0_2] : memref<147x192xbf16, #tpu.memory_space<vmem>>, vector<147x192xbf16>
    %cst = arith.constant dense<0.000000e+00> : vector<144x192xf32>
    %2 = tpu.matmul %0, %1, %cst {dimension_numbers = #tpu.dot_dimension_numbers<[1], [0], [0], [1], [0, 0, 1, 1], [], []>} : vector<144x147xbf16>, vector<147x192xbf16>, vector<144x192xf32> -> vector<144x192xf32>
    %c0_3 = arith.constant 0 : index
    %c0_4 = arith.constant 0 : index
    %3 = vector.load %arg3[%c0_3, %c0_4] : memref<1x192xf32, #tpu.memory_space<vmem>>, vector<1x192xf32>
    %4 = vector.broadcast %3 : vector<1x192xf32> to vector<144x192xf32>
    %5 = arith.addf %2, %4 : vector<144x192xf32>
    %c0_5 = arith.constant 0 : index
    %c0_6 = arith.constant 0 : index
    %6 = vector.load %arg8[%c0_5, %c0_6] : memref<144x192xf32, #tpu.memory_space<vmem>>, vector<144x192xf32>
    tpu.vector_store %arg8[%c0_5, %c0_6], %5 {strides = array<i32>} : memref<144x192xf32, #tpu.memory_space<vmem>>, vector<144x192xf32>,
    %cst_7 = arith.constant 2.000000e+00 : f32
    %7 = vector.broadcast %cst_7 : f32 to vector<20x64xf32>
    %cst_8 = arith.constant 2.000000e+00 : f32
    %8 = vector.broadcast %cst_8 : f32 to vector<3x64xf32>
    %c35 = arith.constant 35 : index
    %c0_9 = arith.constant 0 : index
    %9 = vector.load %arg8[%c35, %c0_9] : memref<144x192xf32, #tpu.memory_space<vmem>>, vector<4x64xf32>
    %c51 = arith.constant 51 : index
    %c0_10 = arith.constant 0 : index
    %10 = vector.load %arg8[%c51, %c0_10] : memref<144x192xf32, #tpu.memory_space<vmem>>, vector<4x64xf32>
    %c67 = arith.constant 67 : index
    %c0_11 = arith.constant 0 : index
    %11 = vector.load %arg8[%c67, %c0_11] : memref<144x192xf32, #tpu.memory_space<vmem>>, vector<4x64xf32>
    %c83 = arith.constant 83 : index
    %c0_12 = arith.constant 0 : index
    %12 = vector.load %arg8[%c83, %c0_12] : memref<144x192xf32, #tpu.memory_space<vmem>>, vector<4x64xf32>
    %13 = tpu.concatenate %7, %8, %9, %8, %8, %10, %8, %8, %11, %8, %8, %12, %8, %7 in 0 : vector<20x64xf32>, vector<3x64xf32>, vector<4x64xf32>, vector<3x64xf32>, vector<3x64xf32>, vector<4x64xf32>, vector<3x64xf32>, vector<3x64xf32>, vector<4x64xf32>, vector<3x64xf32>, vector<3x64xf32>, vector<4x64xf32>, vector<3x64xf32>, vector<20x64xf32> -> vector<80x64xf32>
    %c0_13 = arith.constant 0 : index
    %c0_14 = arith.constant 0 : index
    %14 = vector.load %arg9[%c0_13, %c0_14] : memref<80x64xf32, #tpu.memory_space<vmem>>, vector<80x64xf32>
    tpu.vector_store %arg9[%c0_13, %c0_14], %13 {strides = array<i32>} : memref<80x64xf32, #tpu.memory_space<vmem>>, vector<80x64xf32>,
    %15 = arith.truncf %13 : vector<80x64xf32> to vector<80x64xbf16>
    %16 = vector.extract_strided_slice %15 {offsets = [0, 0], sizes = [74, 64], strides = [1, 1]} : vector<80x64xbf16> to vector<74x64xbf16>
    %17 = vector.extract_strided_slice %15 {offsets = [1, 0], sizes = [74, 64], strides = [1, 1]} : vector<80x64xbf16> to vector<74x64xbf16>
    %18 = vector.extract_strided_slice %15 {offsets = [2, 0], sizes = [74, 64], strides = [1, 1]} : vector<80x64xbf16> to vector<74x64xbf16>
    %19 = vector.extract_strided_slice %15 {offsets = [3, 0], sizes = [74, 64], strides = [1, 1]} : vector<80x64xbf16> to vector<74x64xbf16>
    %20 = vector.extract_strided_slice %15 {offsets = [4, 0], sizes = [74, 64], strides = [1, 1]} : vector<80x64xbf16> to vector<74x64xbf16>
    %21 = vector.extract_strided_slice %15 {offsets = [5, 0], sizes = [74, 64], strides = [1, 1]} : vector<80x64xbf16> to vector<74x64xbf16>
    %22 = vector.extract_strided_slice %15 {offsets = [6, 0], sizes = [74, 64], strides = [1, 1]} : vector<80x64xbf16> to vector<74x64xbf16>
    %23 = tpu.concatenate %16, %17, %18, %19, %20, %21, %22 in 1 : vector<74x64xbf16>, vector<74x64xbf16>, vector<74x64xbf16>, vector<74x64xbf16>, vector<74x64xbf16>, vector<74x64xbf16>, vector<74x64xbf16> -> vector<74x448xbf16>
    %cst_15 = arith.constant 0.000000e+00 : f32
    %24 = vector.broadcast %cst_15 : f32 to vector<14x64xf32>
    %25 = vector.extract_strided_slice %23 {offsets = [0, 0], sizes = [14, 448], strides = [1, 1]} : vector<74x448xbf16> to vector<14x448xbf16>
    %c0_16 = arith.constant 0 : index
    %c0_17 = arith.constant 0 : index
    %26 = vector.load %arg4[%c0_16, %c0_17] : memref<3136x64xbf16, #tpu.memory_space<vmem>>, vector<448x64xbf16>
    %cst_18 = arith.constant dense<0.000000e+00> : vector<14x64xf32>
    %27 = tpu.matmul %25, %26, %cst_18 {dimension_numbers = #tpu.dot_dimension_numbers<[1], [0], [0], [1], [0, 0, 1, 1], [], []>} : vector<14x448xbf16>, vector<448x64xbf16>, vector<14x64xf32> -> vector<14x64xf32>
    %28 = arith.addf %24, %27 : vector<14x64xf32>
    %29 = vector.extract_strided_slice %23 {offsets = [10, 0], sizes = [14, 448], strides = [1, 1]} : vector<74x448xbf16> to vector<14x448xbf16>
    %c448 = arith.constant 448 : index
    %c0_19 = arith.constant 0 : index
    %30 = vector.load %arg4[%c448, %c0_19] : memref<3136x64xbf16, #tpu.memory_space<vmem>>, vector<448x64xbf16>
    %cst_20 = arith.constant dense<0.000000e+00> : vector<14x64xf32>
    %31 = tpu.matmul %29, %30, %cst_20 {dimension_numbers = #tpu.dot_dimension_numbers<[1], [0], [0], [1], [0, 0, 1, 1], [], []>} : vector<14x448xbf16>, vector<448x64xbf16>, vector<14x64xf32> -> vector<14x64xf32>
    %32 = arith.addf %28, %31 : vector<14x64xf32>
    %33 = vector.extract_strided_slice %23 {offsets = [20, 0], sizes = [14, 448], strides = [1, 1]} : vector<74x448xbf16> to vector<14x448xbf16>
    %c896 = arith.constant 896 : index
    %c0_21 = arith.constant 0 : index
    %34 = vector.load %arg4[%c896, %c0_21] : memref<3136x64xbf16, #tpu.memory_space<vmem>>, vector<448x64xbf16>
    %cst_22 = arith.constant dense<0.000000e+00> : vector<14x64xf32>
    %35 = tpu.matmul %33, %34, %cst_22 {dimension_numbers = #tpu.dot_dimension_numbers<[1], [0], [0], [1], [0, 0, 1, 1], [], []>} : vector<14x448xbf16>, vector<448x64xbf16>, vector<14x64xf32> -> vector<14x64xf32>
    %36 = arith.addf %32, %35 : vector<14x64xf32>
    %37 = vector.extract_strided_slice %23 {offsets = [30, 0], sizes = [14, 448], strides = [1, 1]} : vector<74x448xbf16> to vector<14x448xbf16>
    %c1344 = arith.constant 1344 : index
    %c0_23 = arith.constant 0 : index
    %38 = vector.load %arg4[%c1344, %c0_23] : memref<3136x64xbf16, #tpu.memory_space<vmem>>, vector<448x64xbf16>
    %cst_24 = arith.constant dense<0.000000e+00> : vector<14x64xf32>
    %39 = tpu.matmul %37, %38, %cst_24 {dimension_numbers = #tpu.dot_dimension_numbers<[1], [0], [0], [1], [0, 0, 1, 1], [], []>} : vector<14x448xbf16>, vector<448x64xbf16>, vector<14x64xf32> -> vector<14x64xf32>
    %40 = arith.addf %36, %39 : vector<14x64xf32>
    %41 = vector.extract_strided_slice %23 {offsets = [40, 0], sizes = [14, 448], strides = [1, 1]} : vector<74x448xbf16> to vector<14x448xbf16>
    %c1792 = arith.constant 1792 : index
    %c0_25 = arith.constant 0 : index
    %42 = vector.load %arg4[%c1792, %c0_25] : memref<3136x64xbf16, #tpu.memory_space<vmem>>, vector<448x64xbf16>
    %cst_26 = arith.constant dense<0.000000e+00> : vector<14x64xf32>
    %43 = tpu.matmul %41, %42, %cst_26 {dimension_numbers = #tpu.dot_dimension_numbers<[1], [0], [0], [1], [0, 0, 1, 1], [], []>} : vector<14x448xbf16>, vector<448x64xbf16>, vector<14x64xf32> -> vector<14x64xf32>
    %44 = arith.addf %40, %43 : vector<14x64xf32>
    %45 = vector.extract_strided_slice %23 {offsets = [50, 0], sizes = [14, 448], strides = [1, 1]} : vector<74x448xbf16> to vector<14x448xbf16>
    %c2240 = arith.constant 2240 : index
    %c0_27 = arith.constant 0 : index
    %46 = vector.load %arg4[%c2240, %c0_27] : memref<3136x64xbf16, #tpu.memory_space<vmem>>, vector<448x64xbf16>
    %cst_28 = arith.constant dense<0.000000e+00> : vector<14x64xf32>
    %47 = tpu.matmul %45, %46, %cst_28 {dimension_numbers = #tpu.dot_dimension_numbers<[1], [0], [0], [1], [0, 0, 1, 1], [], []>} : vector<14x448xbf16>, vector<448x64xbf16>, vector<14x64xf32> -> vector<14x64xf32>
    %48 = arith.addf %44, %47 : vector<14x64xf32>
    %49 = vector.extract_strided_slice %23 {offsets = [60, 0], sizes = [14, 448], strides = [1, 1]} : vector<74x448xbf16> to vector<14x448xbf16>
    %c2688 = arith.constant 2688 : index
    %c0_29 = arith.constant 0 : index
    %50 = vector.load %arg4[%c2688, %c0_29] : memref<3136x64xbf16, #tpu.memory_space<vmem>>, vector<448x64xbf16>
    %cst_30 = arith.constant dense<0.000000e+00> : vector<14x64xf32>
    %51 = tpu.matmul %49, %50, %cst_30 {dimension_numbers = #tpu.dot_dimension_numbers<[1], [0], [0], [1], [0, 0, 1, 1], [], []>} : vector<14x448xbf16>, vector<448x64xbf16>, vector<14x64xf32> -> vector<14x64xf32>
    %52 = arith.addf %48, %51 : vector<14x64xf32>
    %53 = vector.extract_strided_slice %52 {offsets = [0, 0], sizes = [4, 64], strides = [1, 1]} : vector<14x64xf32> to vector<4x64xf32>
    %54 = vector.extract_strided_slice %52 {offsets = [10, 0], sizes = [4, 64], strides = [1, 1]} : vector<14x64xf32> to vector<4x64xf32>
    %55 = tpu.concatenate %53, %54 in 0 : vector<4x64xf32>, vector<4x64xf32> -> vector<8x64xf32>
    %c0_31 = arith.constant 0 : index
    %c0_32 = arith.constant 0 : index
    %56 = vector.load %arg5[%c0_31, %c0_32] : memref<1x64xf32, #tpu.memory_space<vmem>>, vector<1x64xf32>
    %57 = vector.broadcast %56 : vector<1x64xf32> to vector<8x64xf32>
    %58 = arith.addf %55, %57 : vector<8x64xf32>
    %cst_33 = arith.constant dense<0.000000e+00> : vector<64xf32>
    %59 = vector.multi_reduction <add>, %58, %cst_33 [0] : vector<8x64xf32> to vector<64xf32>
    %60 = vector.shape_cast %59 : vector<64xf32> to vector<1x64xf32>
    %cst_34 = arith.constant 1.250000e-01 : f32
    %61 = vector.broadcast %cst_34 : f32 to vector<1x64xf32>
    %62 = arith.mulf %60, %61 : vector<1x64xf32>
    %63 = vector.broadcast %62 : vector<1x64xf32> to vector<8x64xf32>
    %64 = arith.subf %58, %63 : vector<8x64xf32>
    %65 = arith.mulf %64, %64 : vector<8x64xf32>
    %cst_35 = arith.constant dense<0.000000e+00> : vector<64xf32>
    %66 = vector.multi_reduction <add>, %65, %cst_35 [0] : vector<8x64xf32> to vector<64xf32>
    %67 = vector.shape_cast %66 : vector<64xf32> to vector<1x64xf32>
    %cst_36 = arith.constant 1.250000e-01 : f32
    %68 = vector.broadcast %cst_36 : f32 to vector<1x64xf32>
    %69 = arith.mulf %67, %68 : vector<1x64xf32>
    %cst_37 = arith.constant 9.99999974E-6 : f32
    %70 = vector.broadcast %cst_37 : f32 to vector<1x64xf32>
    %71 = arith.addf %69, %70 : vector<1x64xf32>
    %72 = math.rsqrt %71 : vector<1x64xf32>
    %73 = vector.broadcast %72 : vector<1x64xf32> to vector<8x64xf32>
    %74 = arith.mulf %64, %73 : vector<8x64xf32>
    %c0_38 = arith.constant 0 : index
    %c0_39 = arith.constant 0 : index
    %75 = vector.load %arg6[%c0_38, %c0_39] : memref<1x64xf32, #tpu.memory_space<vmem>>, vector<1x64xf32>
    %76 = vector.broadcast %75 : vector<1x64xf32> to vector<8x64xf32>
    %77 = arith.mulf %74, %76 : vector<8x64xf32>
    %c0_40 = arith.constant 0 : index
    %c0_41 = arith.constant 0 : index
    %78 = vector.load %arg7[%c0_40, %c0_41] : memref<1x64xf32, #tpu.memory_space<vmem>>, vector<1x64xf32>
    %79 = vector.broadcast %78 : vector<1x64xf32> to vector<8x64xf32>
    %80 = arith.addf %77, %79 : vector<8x64xf32>
    %81 = math.tanh %80 : vector<8x64xf32>
    %82 = tpu.concatenate %80, %81 in 1 : vector<8x64xf32>, vector<8x64xf32> -> vector<8x128xf32>
    %c0_42 = arith.constant 0 : index
    %c0_43 = arith.constant 0 : index
    %83 = vector.load %arg10[%c0_42, %c0_43] : memref<8x128xf32, #tpu.memory_space<vmem>>, vector<8x128xf32>
    tpu.vector_store %arg10[%c0_42, %c0_43], %82 {strides = array<i32>} : memref<8x128xf32, #tpu.memory_space<vmem>>, vector<8x128xf32>,
    return
  }
  func.func @transform_0(%arg0: i32) -> (i32, i32) {
    %c0_i32 = arith.constant 0 : i32
    %c0_i32_0 = arith.constant 0 : i32
    %c0_i32_1 = arith.constant 0 : i32
    return %c0_i32, %c0_i32_0 : i32, i32
  }
  func.func @transform_1(%arg0: i32) -> (i32, i32) {
    %c0_i32 = arith.constant 0 : i32
    %c0_i32_0 = arith.constant 0 : i32
    %c0_i32_1 = arith.constant 0 : i32
    return %c0_i32, %c0_i32_0 : i32, i32
  }
  func.func @transform_2(%arg0: i32) -> (i32, i32) {
    %c0_i32 = arith.constant 0 : i32
    %c0_i32_0 = arith.constant 0 : i32
    %c0_i32_1 = arith.constant 0 : i32
    return %c0_i32, %c0_i32_0 : i32, i32
  }
  func.func @transform_3(%arg0: i32) -> (i32, i32) {
    %c0_i32 = arith.constant 0 : i32
    %c0_i32_0 = arith.constant 0 : i32
    %c0_i32_1 = arith.constant 0 : i32
    return %c0_i32, %c0_i32_0 : i32, i32
  }
  func.func @transform_4(%arg0: i32) -> (i32, i32) {
    %c0_i32 = arith.constant 0 : i32
    %c0_i32_0 = arith.constant 0 : i32
    %c0_i32_1 = arith.constant 0 : i32
    return %c0_i32, %c0_i32_0 : i32, i32
  }
  func.func @transform_5(%arg0: i32) -> (i32, i32) {
    %c0_i32 = arith.constant 0 : i32
    %c0_i32_0 = arith.constant 0 : i32
    %c0_i32_1 = arith.constant 0 : i32
    return %c0_i32, %c0_i32_0 : i32, i32
  }
  func.func @transform_6(%arg0: i32) -> (i32, i32) {
    %c0_i32 = arith.constant 0 : i32
    %c0_i32_0 = arith.constant 0 : i32
    %c0_i32_1 = arith.constant 0 : i32
    return %c0_i32, %c0_i32_0 : i32, i32
  }
  func.func @transform_7(%arg0: i32) -> (i32, i32) {
    %c0_i32 = arith.constant 0 : i32
    %c0_i32_0 = arith.constant 0 : i32
    %c0_i32_1 = arith.constant 0 : i32
    return %c0_i32, %c0_i32_0 : i32, i32
  }
  func.func @transform_8(%arg0: i32) -> (i32, i32) {
    %c0_i32 = arith.constant 0 : i32
    %c0_i32_0 = arith.constant 0 : i32
    %c0_i32_1 = arith.constant 0 : i32
    return %c0_i32, %c0_i32_0 : i32, i32
  }
  func.func @transform_9(%arg0: i32) -> (i32, i32) {
    %c0_i32 = arith.constant 0 : i32
    %c0_i32_0 = arith.constant 0 : i32
    %c0_i32_1 = arith.constant 0 : i32
    return %c0_i32, %c0_i32_0 : i32, i32
  }
}

</mosaic_0001>

<bundles_post_ra>
// kernel: model_forward.1
= control target key start
LH: loop header
LB: loop body
LE: loop exit
PB: predicated region body
PF: predicated region fallthrough
CT: control target
= control target key end

     0   :  { %vm255_vm0 = vcmask 154624   ;;  %vm283_vm1 = vcmask 1040384   ;;  %vm284_vm2 = vcmask 1041408   ;;  %v3714_v17 = vmov 65535   ;;  %s3719_s29 = smov 64   ;;  %s5071_s1 = inlined_call_operand.vmem [shape: bf16[147,192], index: 1, kind: input, shape index: {}]   ;;  %s5072_s0 = inlined_call_operand.vmem [shape: bf16[144,147], index: 0, kind: input, shape index: {}]   ;;  %s5073_s8 = inlined_call_operand.vmem [shape: f32[80,64], index: 8, kind: output, shape index: {1}]   ;;  %s5074_s3 = inlined_call_operand.vmem [shape: bf16[3136,64], index: 3, kind: input, shape index: {}]   ;;  %s5075_s2 = inlined_call_operand.vmem [shape: f32[1,192], index: 2, kind: input, shape index: {}]   ;;  %s5076_s7 = inlined_call_operand.vmem [shape: f32[144,192], index: 7, kind: output, shape index: {0}]   ;;  %s5077_s4 = inlined_call_operand.vmem [shape: f32[1,64], index: 4, kind: input, shape index: {}]   ;;  %s5078_s5 = inlined_call_operand.vmem [shape: f32[1,64], index: 5, kind: input, shape index: {}]   ;;  %s5079_s6 = inlined_call_operand.vmem [shape: f32[1,64], index: 6, kind: input, shape index: {}]   ;;  %s5080_s9 = inlined_call_operand.vmem [shape: f32[8,128], index: 9, kind: output, shape index: {2}]  }
   0x1   :  { %v3458_v0 = vld [vmem:[%s5071_s1 + $0x4] ss:$8 sps:$4 sm:$0xff]   ;;  %v3460_v1 = vld [vmem:[%s5071_s1] ss:$8 sps:$4 sm:$0xff]   ;;  %v3461_v2 = vld [vmem:[%s5071_s1 + $0x14] ss:$8 sps:$4 sm:$0xff]   ;;  %v69_v47 = vlaneseq }
   0x2   :  { %293 = vmatprep.subr.bf16.mxu0 %v3458_v0  ;;  %v3463_v3 = vld [vmem:[%s5071_s1 + $0x10] ss:$8 sps:$4 sm:$0xff]   ;;  %v3464_v4 = vld [vmem:[%s5071_s1 + $0x24] ss:$8 sps:$4 sm:$0xff]   ;;  %v3466_v5 = vld [vmem:[%s5071_s1 + $0x20] ss:$8 sps:$4 sm:$0xff]  }
   0x3   :  { %294 = vmatpush1.bf16.msra.mxu0 %v3460_v1  ;;  %v3467_v6 = vld [vmem:[%s5071_s1 + $0x34] ss:$8 sps:$4 sm:$0xff]   ;;  %v3469_v7 = vld [vmem:[%s5071_s1 + $0x30] ss:$8 sps:$4 sm:$0xff]   ;;  %v3470_v8 = vld [vmem:[%s5071_s1 + $0x44] ss:$8 sps:$4 sm:$0xff]  }
   0x4   :  { %295 = vmatprep.subr.bf16.mxu0 %v3461_v2  ;;  %v3489_v9 = vld [vmem:[%s5072_s0 + $0x4] ss:$8 sps:$4 sm:$0xff]   ;;  %v3472_v10 = vld [vmem:[%s5071_s1 + $0x40] ss:$8 sps:$4 sm:$0xff]   ;;  %v3473_v11 = vld [vmem:[%s5071_s1 + $0x54] ss:$8 sps:$4 sm:$0xff]  }
   0x5   :  { %3046 = vmatprep.mubr.msk.bf16.mxu0 %vm255_vm0, %v3489_v9  ;;  %v3475_v12 = vld [vmem:[%s5071_s1 + $0x50] ss:$8 sps:$4 sm:$0xff]   ;;  %v3476_v13 = vld [vmem:[%s5071_s1 + $0x64] ss:$8 sps:$4 sm:$0xff]   ;;  %v3478_v14 = vld [vmem:[%s5071_s1 + $0x60] ss:$8 sps:$4 sm:$0xff]  }
   0x6   :  { %v3479_v15 = vld [vmem:[%s5071_s1 + $0x74] ss:$8 sps:$4 sm:$0xff]   ;;  %v285_v18 = vsel %vm283_vm1, 4294967295, %v3714_v17  ;;  %v3481_v19 = vld [vmem:[%s5071_s1 + $0x70] ss:$8 sps:$4 sm:$0xff]   ;;  %vm417_vm3 = vcmask 523264  }
   0x7   :  { %296 = vmatpush1.bf16.msra.mxu0 %v3463_v3  ;;  %v66_v16 = vld [vmem:[%s5071_s1 + $0x90] sm:$0x33]  ;;  %v3482_v20 = vld [vmem:[%s5071_s1 + $0x84] ss:$8 sps:$4 sm:$0xff]   ;;  %v286_v22 = vsel %vm284_vm2, %v285_v18, 0  ;;  %v3715_v40 = vmov 2.0  }
   0x8   :  { %297 = vmatprep.subr.bf16.mxu0 %v3464_v4  ;;  %v3045_v21 = vcombine.high %v66_v16, %v66_v16  ;;  %v3484_v23 = vld [vmem:[%s5071_s1 + $0x80] ss:$8 sps:$4 sm:$0xff]   ;;  %v3044_v24 = vcombine.low %v66_v16, %v66_v16  ;;  %v3490_v28 = vld [vmem:[%s5072_s0 + $0x14] ss:$8 sps:$4 sm:$0xff]   ;;  %v3492_v29 = vld [vmem:[%s5072_s0 + $0x10] ss:$8 sps:$4 sm:$0xff]  }
   0x9   :  { %v3487_v27 = vld [vmem:[%s5072_s0] ss:$8 sps:$4 sm:$0xff]   ;;  %v3493_v30 = vld [vmem:[%s5072_s0 + $0x24] ss:$8 sps:$4 sm:$0xff]   ;;  %v3496_v32 = vld [vmem:[%s5072_s0 + $0x34] ss:$8 sps:$4 sm:$0xff]  }
   0xa   :  { %v291_v25 = vand.u32 %v3045_v21, %v286_v22  ;;  %v288_v26 = vand.u32 %v3044_v24, %v286_v22  ;;  %v3495_v31 = vld [vmem:[%s5072_s0 + $0x20] ss:$8 sps:$4 sm:$0xff]   ;;  %v3498_v33 = vld [vmem:[%s5072_s0 + $0x30] ss:$8 sps:$4 sm:$0xff]   ;;  %v3499_v34 = vld [vmem:[%s5072_s0 + $0x44] ss:$8 sps:$4 sm:$0xff]  }
   0xb   :  { %298 = vmatpush1.bf16.msra.mxu0 %v3466_v5  ;;  %v3501_v35 = vld [vmem:[%s5072_s0 + $0x40] ss:$8 sps:$4 sm:$0xff]   ;;  %v3502_v36 = vld [vmem:[%s5072_s0 + $0x54] ss:$8 sps:$4 sm:$0xff]   ;;  %v3504_v37 = vld [vmem:[%s5072_s0 + $0x50] ss:$8 sps:$4 sm:$0xff]  }
   0xc   :  { %299 = vmatprep.subr.bf16.mxu0 %v3467_v6  ;;  %v3505_v38 = vld [vmem:[%s5072_s0 + $0x64] ss:$8 sps:$4 sm:$0xff]   ;;  %v3507_v39 = vld [vmem:[%s5072_s0 + $0x60] ss:$8 sps:$4 sm:$0xff]   ;;  %481 = vst.msk [vmem:[%s5073_s8] sm:$0xff] %vm417_vm3, %v3715_v40  ;;  %482 = vst.msk [vmem:[%s5073_s8 + $0x8] sm:$0xff] %vm417_vm3, %v3715_v40 }
   0xd   :  { %489 = vst.msk [vmem:[%s5073_s8 + $0x40] sm:$0xff] %vm417_vm3, %v3715_v40  ;;  %490 = vst.msk [vmem:[%s5073_s8 + $0x48] sm:$0xff] %vm417_vm3, %v3715_v40  ;;  %v3508_v41 = vld [vmem:[%s5072_s0 + $0x74] ss:$8 sps:$4 sm:$0xff]   ;;  %v3510_v42 = vld [vmem:[%s5072_s0 + $0x70] ss:$8 sps:$4 sm:$0xff]  }
   0xe   :  { %v3511_v43 = vld [vmem:[%s5072_s0 + $0x84] ss:$8 sps:$4 sm:$0xff]   ;;  %v3513_v44 = vld [vmem:[%s5072_s0 + $0x80] ss:$8 sps:$4 sm:$0xff]   ;;  %v3716_v45 = vmov 0   ;;  %v3516_v50 = vld [vmem:[%s5074_s3 + $0x170] sm:$0xff]  }
   0xf   :  { %300 = vmatpush1.bf16.msra.mxu0 %v3469_v7  ;;  %v3514_v46 = vld [vmem:[%s5074_s3 + $0x160] sm:$0xff]   ;;  %v3515_v48 = vld [vmem:[%s5074_s3 + $0x168] sm:$0xff]   ;;  %v70_v52 = vshrl.u32 %v69_v47, 7  ;;  %v3523_v55 = vld [vmem:[%s5074_s3 + $0x130] sm:$0xff]   ;;  %vm466_vm4 = vcmask 1046528   ;;  %vm468_vm5 = vcmask 1042432  }
  0x10   :  { %301 = vmatprep.subr.bf16.mxu0 %v3470_v8  ;;  %v3517_v49 = vld [vmem:[%s5074_s3 + $0x120] sm:$0xff]   ;;  %v3520_v53 = vld [vmem:[%s5074_s3 + $0x128] sm:$0xff]   ;;  %v3518_v57 = vld [vmem:[%s5074_s3 + $0x178] sm:$0xff]   ;;  %vm470_vm6 = vcmask 1045504   ;;  %vm495_vm7 = vsmask.f32 7424 }
  0x11   :  { %3261 = vmatprep.subr.bf16.mxu1 %v3517_v49  ;;  %v3519_v51 = vld [vmem:[%s5074_s3 + $0xe0] sm:$0xff]   ;;  %v3522_v54 = vld [vmem:[%s5074_s3 + $0xe8] sm:$0xff]   ;;  %v71_v56 = vsub.s32 0, %v70_v52  ;;  %v75_v58 = vsub.s32 1, %v70_v52  ;;  %v3525_v59 = vld [vmem:[%s5074_s3 + $0xf0] sm:$0xff]   ;;  %vm473_vm9 = vcmask 1044480  }
  0x12   :  { %3262 = vmatpush3.bf16.msra.mxu1 %v3519_v51  ;;  %v3521_v60 = vld [vmem:[%s5074_s3 + $0x180] sm:$0xff]   ;;  %v3524_v61 = vld [vmem:[%s5074_s3 + $0x188] sm:$0xff]   ;;  %vm551_vm8 = vsmask.f32 6400  ;;  %vm479_vm10 = vcmask 1043456  }
  0x13   :  { %302 = vmatpush1.bf16.msra.mxu0 %v3472_v10  ;;  %3263 = vmatprep.subr.bf16.mxu1 %v3520_v53  ;;  %v67_v62 = vld [vmem:[%s5075_s2] sm:$0x3]  ;;  %v3532_v51 = vld [vmem:[%s5074_s3 + $0x148] sm:$0xff]   ;;  %vm587_vm11 = vsmask.f32 5376 }
  0x14   :  { %303 = vmatprep.subr.bf16.mxu0 %v3473_v11  ;;  %v3955_v63 = vrot.slane %v67_v62, %v71_v56  ;;  %v3957_v0 = vrot.slane %v67_v62, %v75_v58  ;;  %v3529_v40 = vld [vmem:[%s5074_s3 + $0x140] sm:$0xff]  }
  0x16   :  { %3264 = vmatpush3.bf16.msra.mxu1 %v3522_v54  ;;  %v3533_v54 = vld [vmem:[%s5074_s3 + $0x1a0] sm:$0xff]  }
  0x17   :  { %304 = vmatpush1.bf16.msra.mxu0 %v3475_v12  ;;  %3265 = vmatprep.subr.bf16.mxu1 %v3523_v55 }
  0x18   :  { %305 = vmatprep.subr.bf16.mxu0 %v3476_v13 }
  0x1a   :  { %3266 = vmatpush3.bf16.msra.mxu1 %v3525_v59  ;;  %v3534_v59 = vld [vmem:[%s5074_s3 + $0x108] sm:$0xff]  }
  0x1b   :  { %306 = vmatpush1.bf16.msra.mxu0 %v3478_v14 }
  0x1c   :  { %307 = vmatprep.subr.bf16.mxu0 %v3479_v15 }
  0x1f   :  { %308 = vmatpush1.bf16.msra.mxu0 %v3481_v19 }
  0x20   :  { %309 = vmatprep.subr.bf16.mxu0 %v3482_v20 }
  0x23   :  { %310 = vmatpush1.bf16.msra.mxu0 %v3484_v23 }
  0x24   :  { %311 = vmatprep.subr.bf16.mxu0 %v291_v25 }
  0x27   :  { %312 = vmatpush1.bf16.msra.mxu0 %v288_v26 }
  0x28   :  { %1012 = vmatprep.subr.bf16.mxu0 %v3716_v45 }
  0x2a   :  { %326 = vmatmul.mubr.bf16.vlgmr.msra.gmra.mrb[0].mxu0 %v3487_v27 }
  0x2b   :  { %3047 = vmatprep.mubr.msk.bf16.mxu0 %vm255_vm0, %v3490_v28  ;;  %1013 = vmatpush1.bf16.msra.mxu0 %v3514_v46  ;;  %v3717_v28 = vmov 1073741824   ;;  %v3718_v46 = vmov 16384  }
  0x2c   :  { %1014 = vmatprep.subr.bf16.mxu0 %v3716_v45  ;;  %v552_v47 = vrot.slane %v3718_v46, 1 }
  0x2f   :  { %1015 = vmatpush1.bf16.msra.mxu0 %v3515_v48  ;;  %v3531_v48 = vld [vmem:[%s5074_s3 + $0x100] sm:$0xff]  }
  0x30   :  { %1016 = vmatprep.subr.bf16.mxu0 %v3716_v45 }
  0x32   :  { %336 = vmatmul.mubr.bf16.gmra.mrb[4].mxu0 %v3492_v29  ;;  %v4015_v29 = vrot.slane %v3717_v28, 1 }
  0x33   :  { %3048 = vmatprep.mubr.msk.bf16.mxu0 %vm255_vm0, %v3493_v30  ;;  %1017 = vmatpush1.bf16.msra.mxu0 %v3516_v50  ;;  %v553_v50 = vrot.slane %v3717_v28, 2 }
  0x34   :  { %1018 = vmatprep.subr.bf16.mxu0 %v3716_v45 }
  0x35   :  { %v4090_v62 = vor.u32 %v553_v50, %v552_v47 }
  0x37   :  { %1019 = vmatpush1.bf16.msra.mxu0 %v3518_v57 }
  0x38   :  { %1020 = vmatprep.subr.bf16.mxu0 %v3716_v45 }
  0x3a   :  { %346 = vmatmul.mubr.bf16.gmra.mrb[8].mxu0 %v3495_v31 }
  0x3b   :  { %3049 = vmatprep.mubr.msk.bf16.mxu0 %vm255_vm0, %v3496_v32  ;;  %1021 = vmatpush1.bf16.msra.mxu0 %v3521_v60 }
  0x3c   :  { %1022 = vmatprep.subr.bf16.mxu0 %v3716_v45 }
  0x3f   :  { %1023 = vmatpush1.bf16.msra.mxu0 %v3524_v61 }
  0x40   :  { %1024 = vmatprep.subr.bf16.mxu0 %v3716_v45 }
  0x42   :  { %356 = vmatmul.mubr.bf16.gmra.mrb[12].mxu0 %v3498_v33  ;;  %v3526_v33 = vld [vmem:[%s5074_s3 + $0x138] sm:$0xff]  }
  0x43   :  { %3050 = vmatprep.mubr.msk.bf16.mxu0 %vm255_vm0, %v3499_v34  ;;  %v3527_v34 = vld [vmem:[%s5074_s3 + $0x190] sm:$0xff]   ;;  %3267 = vmatprep.subr.bf16.mxu1 %v3526_v33  ;;  %v3540_v33 = vld [vmem:[%s5074_s3 + $0x118] sm:$0xff]  }
  0x44   :  { %1025 = vmatpush1.bf16.msra.mxu0 %v3527_v34 }
  0x45   :  { %1026 = vmatprep.subr.bf16.mxu0 %v3716_v45 }
  0x4a   :  { %366 = vmatmul.mubr.bf16.gmra.mrb[16].mxu0 %v3501_v35 }
  0x4b   :  { %3051 = vmatprep.mubr.msk.bf16.mxu0 %vm255_vm0, %v3502_v36 }
  0x52   :  { %376 = vmatmul.mubr.bf16.gmra.mrb[20].mxu0 %v3504_v37 }
  0x53   :  { %3052 = vmatprep.mubr.msk.bf16.mxu0 %vm255_vm0, %v3505_v38  ;;  %v3528_v38 = vld [vmem:[%s5074_s3 + $0xf8] sm:$0xff]  }
  0x54   :  { %3268 = vmatpush3.bf16.msra.mxu1 %v3528_v38  ;;  %v589_v38 = vrot.slane %v3717_v28, 3 }
  0x55   :  { %3269 = vmatprep.subr.bf16.mxu1 %v3529_v40 }
  0x58   :  { %3270 = vmatpush3.bf16.msra.mxu1 %v3531_v48 }
  0x59   :  { %3271 = vmatprep.subr.bf16.mxu1 %v3532_v51 }
  0x5a   :  { %386 = vmatmul.mubr.bf16.gmra.mrb[24].mxu0 %v3507_v39 }
  0x5b   :  { %3053 = vmatprep.mubr.msk.bf16.mxu0 %vm255_vm0, %v3508_v41  ;;  %v3530_v41 = vld [vmem:[%s5074_s3 + $0x198] sm:$0xff]  }
  0x5c   :  { %1027 = vmatpush1.bf16.msra.mxu0 %v3530_v41  ;;  %3272 = vmatpush3.bf16.msra.mxu1 %v3534_v59 }
  0x5d   :  { %1028 = vmatprep.subr.bf16.mxu0 %v3716_v45 }
  0x60   :  { %1029 = vmatpush1.bf16.msra.mxu0 %v3533_v54 }
  0x61   :  { %1030 = vmatprep.subr.bf16.mxu0 %v3716_v45 }
  0x62   :  { %396 = vmatmul.mubr.bf16.gmra.mrb[28].mxu0 %v3510_v42 }
  0x63   :  { %3054 = vmatprep.mubr.msk.bf16.mxu0 %vm255_vm0, %v3511_v43 }
  0x6a   :  { %406 = vmatmul.mubr.bf16.gmra.mrb[32].mxu0 %v3513_v44  ;;  %v502_v44 = vor.u32 16384, %v4015_v29 }
  0xfd   :  { %v327_v1 = vpop.f32.mrb[0].mxu0 }
  0xfe   :  { %v328_v2 = vadd.f32 %v327_v1, %v3955_v63  ;;  %v329_v3 = vpop.f32.mrb[1].mxu0 }
  0xff   :  { %v330_v4 = vadd.f32 %v329_v3, %v3957_v0  ;;  %v331_v5 = vpop.f32.mrb[2].mxu0 }
 0x100   :  { %416 = vst [vmem:[%s5076_s7] sm:$0xff] %v328_v2  ;;  %v332_v6 = vadd.f32 %v331_v5, %v3955_v63  ;;  %v333_v7 = vpop.f32.mrb[3].mxu0  ;;  %v3535_v2 = vld [vmem:[%s5074_s3 + $0x150] sm:$0xff]  }
 0x101   :  { %418 = vst.msk [vmem:[%s5076_s7 + $0x8] sm:$0xff] %vm417_vm3, %v330_v4  ;;  %v334_v8 = vadd.f32 %v333_v7, %v3957_v0  ;;  %3273 = vmatprep.subr.bf16.mxu1 %v3535_v2 }
 0x102   :  { %419 = vst [vmem:[%s5076_s7 + $0x10] sm:$0xff] %v332_v6 }
 0x103   :  { %420 = vst.msk [vmem:[%s5076_s7 + $0x18] sm:$0xff] %vm417_vm3, %v334_v8 }
 0x105   :  { %v337_v9 = vpop.f32.mrb[4].mxu0 }
 0x106   :  { %v338_v10 = vadd.f32 %v337_v9, %v3955_v63  ;;  %v339_v11 = vpop.f32.mrb[5].mxu0 }
 0x107   :  { %v340_v12 = vadd.f32 %v339_v11, %v3957_v0  ;;  %v341_v13 = vpop.f32.mrb[6].mxu0 }
 0x108   :  { %421 = vst [vmem:[%s5076_s7 + $0x20] sm:$0xff] %v338_v10  ;;  %v342_v14 = vadd.f32 %v341_v13, %v3955_v63  ;;  %v343_v15 = vpop.f32.mrb[7].mxu0  ;;  %v3536_v10 = vld [vmem:[%s5074_s3 + $0x1a8] sm:$0xff]   ;;  %v3537_v13 = vld [vmem:[%s5074_s3 + $0x110] sm:$0xff]  }
 0x109   :  { %422 = vst.msk [vmem:[%s5076_s7 + $0x28] sm:$0xff] %vm417_vm3, %v340_v12  ;;  %v344_v16 = vadd.f32 %v343_v15, %v3957_v0  ;;  %1031 = vmatpush1.bf16.msra.mxu0 %v3536_v10  ;;  %3274 = vmatpush3.bf16.msra.mxu1 %v3537_v13 }
 0x10a   :  { %423 = vst [vmem:[%s5076_s7 + $0x30] sm:$0xff] %v342_v14  ;;  %1032 = vmatprep.subr.bf16.mxu0 %v3716_v45 }
 0x10b   :  { %424 = vst.msk [vmem:[%s5076_s7 + $0x38] sm:$0xff] %vm417_vm3, %v344_v16 }
 0x10d   :  { %v347_v17 = vpop.f32.mrb[8].mxu0 }
 0x10e   :  { %v348_v18 = vadd.f32 %v347_v17, %v3955_v63  ;;  %v349_v19 = vpop.f32.mrb[9].mxu0 }
 0x10f   :  { %v350_v20 = vadd.f32 %v349_v19, %v3957_v0  ;;  %v351_v21 = vpop.f32.mrb[10].mxu0 }
 0x110   :  { %425 = vst [vmem:[%s5076_s7 + $0x40] sm:$0xff] %v348_v18  ;;  %v352_v22 = vadd.f32 %v351_v21, %v3955_v63  ;;  %v353_v23 = vpop.f32.mrb[11].mxu0  ;;  %v3720_v21 = vmov 2.0|2.0  }
 0x111   :  { %426 = vst.msk [vmem:[%s5076_s7 + $0x48] sm:$0xff] %vm417_vm3, %v350_v20  ;;  %v354_v24 = vadd.f32 %v353_v23, %v3957_v0 }
 0x112   :  { %427 = vst [vmem:[%s5076_s7 + $0x50] sm:$0xff] %v352_v22  ;;  %v4148_v22 = vrot.slane %v3720_v21, 3 }
 0x113   :  { %428 = vst.msk [vmem:[%s5076_s7 + $0x58] sm:$0xff] %vm417_vm3, %v354_v24 }
 0x115   :  { %v357_v25 = vpop.f32.mrb[12].mxu0 }
 0x116   :  { %v358_v26 = vadd.f32 %v357_v25, %v3955_v63  ;;  %v359_v27 = vpop.f32.mrb[13].mxu0  ;;  %v3538_v25 = vld [vmem:[%s5074_s3 + $0x158] sm:$0xff]  }
 0x117   :  { %v360_v30 = vadd.f32 %v359_v27, %v3957_v0  ;;  %v361_v31 = vpop.f32.mrb[14].mxu0  ;;  %v453_v32 = vld [vmem:[%s5076_s7 + $0x40] sm:$0x78]  ;;  %3275 = vmatprep.subr.bf16.mxu1 %v3538_v25 }
 0x118   :  { %429 = vst [vmem:[%s5076_s7 + $0x60] sm:$0xff] %v358_v26  ;;  %v362_v35 = vadd.f32 %v361_v31, %v3955_v63  ;;  %v363_v36 = vpop.f32.mrb[15].mxu0  ;;  %v458_v37 = vrot.slane %v453_v32, 4  ;;  %v3539_v26 = vld [vmem:[%s5074_s3 + $0x1b0] sm:$0xff]   ;;  %3276 = vmatpush3.bf16.msra.mxu1 %v3540_v33 }
 0x119   :  { %430 = vst.msk [vmem:[%s5076_s7 + $0x68] sm:$0xff] %vm417_vm3, %v360_v30  ;;  %v364_v39 = vadd.f32 %v363_v36, %v3957_v0  ;;  %1033 = vmatpush1.bf16.msra.mxu0 %v3539_v26  ;;  %1265 = vmatprep.subr.bf16.mxu1 %v3716_v45 }
 0x11a   :  { %431 = vst [vmem:[%s5076_s7 + $0x70] sm:$0xff] %v362_v35  ;;  %v467_v42 = vsel %vm466_vm4, 2.0, %v458_v37  ;;  %v469_v43 = vsel %vm468_vm5, %v458_v37, 2.0  ;;  %1034 = vmatprep.subr.bf16.mxu0 %v3716_v45  ;;  %v588_v37 = vrot.slane %v3718_v46, 2 }
 0x11b   :  { %432 = vst.msk [vmem:[%s5076_s7 + $0x78] sm:$0xff] %vm417_vm3, %v364_v39  ;;  %v471_v49 = vsel %vm470_vm6, %v469_v43, 2.0  ;;  %483 = vst.msk [vmem:[%s5073_s8 + $0x10] sm:$0xff] %vm417_vm3, %v467_v42  ;;  %v3541_v39 = vld [vmem:[%s5074_s3 + $0x1b8] sm:$0xff]   ;;  %v3543_v43 = vld [vmem:[%s5074_s3 + $0x40] sm:$0xff]  }
 0x11c   :  { %484 = vst.msk [vmem:[%s5073_s8 + $0x18] sm:$0xff] %vm417_vm3, %v471_v49  ;;  %v4073_v52 = vpack.c.bf16 %v471_v49, %v467_v42 }
 0x11d   :  { %v367_v53 = vpop.f32.mrb[16].mxu0  ;;  %1035 = vmatpush1.bf16.msra.mxu0 %v3541_v39 }
 0x11e   :  { %v368_v55 = vadd.f32 %v367_v53, %v3955_v63  ;;  %v369_v56 = vpop.f32.mrb[17].mxu0  ;;  %v4080_v57 = vshll.u32 %v4073_v52, 16  ;;  %v4083_v58 = vshrl.u32 %v4073_v52, 16  ;;  %v616_v30 = vrot.slane %v4073_v52, 3  ;;  %3283 = vmatprep.subr.bf16.mxu0 %v3543_v43 }
 0x11f   :  { %v370_v60 = vadd.f32 %v369_v56, %v3957_v0  ;;  %v371_v61 = vpop.f32.mrb[18].mxu0  ;;  %v454_v1 = vld [vmem:[%s5076_s7 + $0x60] sm:$0x78] }
 0x120   :  { %433 = vst [vmem:[%s5076_s7 + $0x80] sm:$0xff] %v368_v55  ;;  %v372_v3 = vadd.f32 %v371_v61, %v3955_v63  ;;  %v373_v4 = vpop.f32.mrb[19].mxu0  ;;  %v506_v5 = vrot.slane %v4080_v57, 1  ;;  %v555_v6 = vrot.slane %v4083_v58, 1  ;;  %v556_v7 = vrot.slane %v4080_v57, 2 }
 0x121   :  { %434 = vst.msk [vmem:[%s5076_s7 + $0x88] sm:$0xff] %vm417_vm3, %v370_v60  ;;  %v374_v8 = vadd.f32 %v373_v4, %v3957_v0  ;;  %v461_v9 = vrot.slane %v454_v1, 2  ;;  %v4197_v41 = vsel %vm473_vm9, %v4148_v22, %v616_v30  ;;  %v591_v47 = vrot.slane %v4083_v58, 2 }
 0x122   :  { %435 = vst [vmem:[%s5076_s7 + $0x90] sm:$0xff] %v372_v3  ;;  %v507_v11 = vsel %vm495_vm7, %v502_v44, %v506_v5  ;;  %v4121_v12 = vor.u32 %v556_v7, %v555_v6  ;;  %v510_v46 = vor.u32 %v4083_v58, %v506_v5  ;;  %v592_v48 = vrot.slane %v4080_v57, 3 }
 0x123   :  { %436 = vst.msk [vmem:[%s5076_s7 + $0x98] sm:$0xff] %vm417_vm3, %v374_v8  ;;  %528 = vrot.lane.b32.xlu1 %v507_v11, %s3719_s29  ;;  %v472_v14 = vsel %vm283_vm1, 2.0, %v461_v9  ;;  %v794_v54 = vrot.slane %v4197_v41, 5  ;;  %v590_v3 = vor.u32 %v589_v38, %v588_v37 }
 0x124   :  { %v558_v15 = vsel %vm551_vm8, %v4090_v62, %v4121_v12  ;;  %v474_v16 = vsel %vm473_vm9, %v472_v14, 2.0  ;;  %v593_v5 = vor.u32 %v592_v48, %v591_v47  ;;  %v4247_v14 = vrot.slane %v3720_v21, 1 }
 0x125   :  { %v377_v17 = vpop.f32.mrb[20].mxu0  ;;  %568 = vrot.lane.b32.xlu0 %v558_v15, %s3719_s29  ;;  %485 = vst.msk [vmem:[%s5073_s8 + $0x20] sm:$0xff] %vm417_vm3, %v474_v16 }
 0x126   :  { %v378_v18 = vadd.f32 %v377_v17, %v3955_v63  ;;  %v379_v19 = vpop.f32.mrb[21].mxu0  ;;  %v594_v11 = vsel %vm587_vm11, %v590_v3, %v593_v5 }
 0x127   :  { %v455_v20 = vld [vmem:[%s5076_s7 + $0x80] sm:$0x78]  ;;  %v380_v23 = vadd.f32 %v379_v19, %v3957_v0  ;;  %v381_v24 = vpop.f32.mrb[22].mxu0 }
 0x128   :  { %437 = vst [vmem:[%s5076_s7 + $0xa0] sm:$0xff] %v378_v18  ;;  %v475_v27 = vsel %vm468_vm5, 2.0, %v455_v20  ;;  %v382_v31 = vadd.f32 %v381_v24, %v3955_v63  ;;  %v383_v32 = vpop.f32.mrb[23].mxu0 }
 0x129   :  { %v476_v34 = vsel %vm466_vm4, %v475_v27, 2.0  ;;  %438 = vst.msk [vmem:[%s5076_s7 + $0xa8] sm:$0xff] %vm417_vm3, %v380_v23  ;;  %v384_v35 = vadd.f32 %v383_v32, %v3957_v0 }
 0x12a   :  { %486 = vst.msk [vmem:[%s5073_s8 + $0x28] sm:$0xff] %vm417_vm3, %v476_v34  ;;  %v4176_v36 = vpack.c.bf16 %v476_v34, %v474_v16  ;;  %439 = vst [vmem:[%s5076_s7 + $0xb0] sm:$0xff] %v382_v31 }
 0x12b   :  { %440 = vst.msk [vmem:[%s5076_s7 + $0xb8] sm:$0xff] %vm417_vm3, %v384_v35 }
 0x12c   :  { %v4193_v40 = vshll.u32 %v4176_v36, 16  ;;  %v618_v28 = vrot.slane %v4176_v36, 3  ;;  %v4201_v42 = vshrl.u32 %v4176_v36, 16 }
 0x12e   :  { %v514_v49 = vrot.slane %v4193_v40, 1  ;;  %v619_v50 = vsel %vm473_vm9, %v616_v30, %v618_v28  ;;  %v559_v51 = vrot.slane %v4201_v42, 1  ;;  %v560_v53 = vrot.slane %v4193_v40, 2 }
 0x12f   :  { %v795_v55 = vrot.slane %v619_v50, 5  ;;  %v595_v56 = vrot.slane %v4201_v42, 2  ;;  %v596_v59 = vrot.slane %v4193_v40, 3  ;;  %v456_v57 = vld [vmem:[%s5076_s7 + $0xa0] sm:$0x78]  ;;  %v1374_v23 = vrot.slane %v619_v50, 2 }
 0x130   :  { %v515_v58 = vsel %vm495_vm7, %v510_v46, %v514_v49  ;;  %v561_v60 = vor.u32 %v560_v53, %v559_v51  ;;  %v464_v61 = vrot.slane %v456_v57, 6  ;;  %v1701_v24 = vrot.slane %v619_v50, 7 }
 0x131   :  { %530 = vrot.lane.b32.xlu1 %v515_v58, %s3719_s29  ;;  %v796_v1 = vsel %vm468_vm5, %v794_v54, %v795_v55  ;;  %v597_v2 = vor.u32 %v596_v59, %v595_v56  ;;  %v2680_v40 = vrot.slane %v4148_v22, 6  ;;  %v544_v55 = vrot.slane %v4073_v52, 1 }
 0x132   :  { %3083 = vmatprep.mubr.msk.bf16.mxu0 %vm417_vm3, %v796_v1  ;;  %v562_v4 = vsel %vm551_vm8, %v4121_v12, %v561_v60  ;;  %v477_v6 = vsel %vm473_vm9, 2.0, %v464_v61  ;;  %v478_v7 = vsel %vm283_vm1, %v464_v61, 2.0  ;;  %v546_v59 = vrot.slane %v4176_v36, 1 }
 0x133   :  { %570 = vrot.lane.b32.xlu0 %v562_v4, %s3719_s29  ;;  %v480_v8 = vsel %vm479_vm10, %v478_v7, 2.0  ;;  %487 = vst.msk [vmem:[%s5073_s8 + $0x30] sm:$0xff] %vm417_vm3, %v477_v6  ;;  %v598_v9 = vsel %vm587_vm11, %v593_v5, %v597_v2  ;;  %v545_v57 = vsel %vm466_vm4, %v4247_v14, %v544_v55 }
 0x134   :  { %488 = vst.msk [vmem:[%s5073_s8 + $0x38] sm:$0xff] %vm417_vm3, %v480_v8  ;;  %v4240_v10 = vpack.c.bf16 %v480_v8, %v477_v6  ;;  %v547_v61 = vsel %vm466_vm4, %v544_v55, %v546_v59  ;;  %v3550_v55 = vld [vmem:[%s5074_s3 + $0x10] sm:$0xff]  }
 0x135   :  { %606 = vrot.lane.b32.xlu1 %v598_v9, %s3719_s29 }
 0x136   :  { %v520_v12 = vshll.u32 %v4240_v10, 16  ;;  %v524_v13 = vshrl.u32 %v4240_v10, 16  ;;  %v548_v15 = vrot.slane %v4240_v10, 1  ;;  %v620_v16 = vrot.slane %v4240_v10, 3 }
 0x137   :  { %604 = vrot.lane.b32.xlu0 %v594_v11, %s3719_s29 }
 0x138   :  { %v599_v17 = vrot.slane %v524_v13, 2  ;;  %v600_v18 = vrot.slane %v520_v12, 3  ;;  %v563_v19 = vrot.slane %v524_v13, 1  ;;  %v564_v20 = vrot.slane %v520_v12, 2 }
 0x139   :  { %v4256_v27 = vsel %vm466_vm4, %v548_v15, %v4247_v14  ;;  %v621_v30 = vsel %vm473_vm9, %v618_v28, %v620_v16  ;;  %v522_v35 = vrot.slane %v520_v12, 1  ;;  %v518_v28 = vor.u32 %v4201_v42, %v514_v49 }
 0x13a   :  { %v601_v25 = vor.u32 %v600_v18, %v599_v17  ;;  %v565_v26 = vor.u32 %v564_v20, %v563_v19  ;;  %v1375_v31 = vrot.slane %v621_v30, 2  ;;  %v1702_v32 = vrot.slane %v621_v30, 7 }
 0x13b   :  { %v2031_v39 = vrot.slane %v621_v30, 4  ;;  %v526_v46 = vor.u32 %v524_v13, %v522_v35  ;;  %v4274_v47 = vsel %vm473_vm9, %v620_v16, %v4148_v22  ;;  %v523_v48 = vsel %vm495_vm7, %v518_v28, %v522_v35 }
 0x13c   :  { %v602_v33 = vsel %vm587_vm11, %v597_v2, %v601_v25  ;;  %v566_v34 = vsel %vm551_vm8, %v561_v60, %v565_v26  ;;  %v4264_v37 = vsel %vm470_vm6, %v1374_v23, %v1375_v31  ;;  %v4267_v38 = vsel %vm283_vm1, %v1701_v24, %v1702_v32  ;;  %v3544_v23 = vld [vmem:[%s5074_s3] sm:$0xff]  }
 0x13d   :  { %608 = vrot.lane.b32.xlu0 %v602_v33, %s3719_s29  ;;  %572 = vrot.lane.b32.xlu1 %v566_v34, %s3719_s29  ;;  %v603_v43 = vsel %vm587_vm11, %v601_v25, %v590_v3  ;;  %v2032_v50 = vrot.slane %v4274_v47, 4  ;;  %v2679_v51 = vrot.slane %v4274_v47, 6  ;;  %v567_v42 = vsel %vm551_vm8, %v565_v26, %v4090_v62  ;;  %v3545_v25 = vld [vmem:[%s5074_s3 + $0x88] sm:$0xff]  }
 0x13e   :  { %v527_v49 = vsel %vm495_vm7, %v526_v46, %v4015_v29  ;;  %v582_v60 = vrot.slane %v4176_v36, 2  ;;  %v580_v2 = vrot.slane %v4073_v52, 2  ;;  %v584_v24 = vrot.slane %v4240_v10, 2  ;;  %v3546_v26 = vld [vmem:[%s5074_s3 + $0x48] sm:$0xff]  }
 0x13f   :  { %v4286_v53 = vsel %vm479_vm10, %v2031_v39, %v2032_v50  ;;  %v4289_v22 = vsel %vm284_vm2, %v2679_v51, %v2680_v40  ;;  %v3547_v34 = vld [vmem:[%s5074_s3 + $0x8] sm:$0xff]   ;;  %v3548_v40 = vld [vmem:[%s5074_s3 + $0x90] sm:$0xff]  }
 0x140   :  { %v583_v8 = vsel %vm470_vm6, %v580_v2, %v582_v60  ;;  %v585_v31 = vsel %vm470_vm6, %v582_v60, %v584_v24  ;;  %v3552_v60 = vld [vmem:[%s5074_s3 + $0x58] sm:$0xff]  }
 0x141   :  { %532 = vrot.lane.b32.xlu0 %v523_v48, %s3719_s29  ;;  %610 = vrot.lane.b32.xlu1 %v603_v43, %s3719_s29 }
 0x145   :  { %574 = vrot.lane.b32.xlu0 %v567_v42, %s3719_s29  ;;  %534 = vrot.lane.b32.xlu1 %v527_v49, %s3719_s29 }
 0x149   :  { %576 = vrot.lane.b32.xlu0 %v4090_v62, %s3719_s29  ;;  %536 = vrot.lane.b32.xlu1 %v502_v44, %s3719_s29 }
 0x14d   :  { %612 = vrot.lane.b32.xlu0 %v590_v3, %s3719_s29  ;;  %v4315_v3 = vrot.slane %v3720_v21, 2 }
 0x14f   :  { %v581_v21 = vsel %vm470_vm6, %v4315_v3, %v580_v2  ;;  %v586_v49 = vsel %vm470_vm6, %v584_v24, %v4315_v3  ;;  %v3564_v24 = vld [vmem:[%s5074_s3 + $0x78] sm:$0xff]  }
 0x195   :  { %v529_v54 = vpop.permute.xlu1 %528 }
 0x196   :  { %v4310_v44 = vsel %vm417_vm3, 2.0|2.0, %v529_v54 }
 0x197   :  { %v569_v56 = vpop.permute.xlu0 %568  ;;  %v785_v11 = vrot.slane %v4310_v44, 5 }
 0x198   :  { %v636_v62 = vsel %vm417_vm3, %v545_v57, %v569_v56 }
 0x199   :  { %v788_v6 = vrot.slane %v636_v62, 5 }
 0x1a3   :  { %v531_v58 = vpop.permute.xlu1 %530 }
 0x1a4   :  { %v4307_v29 = vsel %vm417_vm3, %v4073_v52, %v531_v58  ;;  %v3542_v52 = vld [vmem:[%s5074_s3 + $0x80] sm:$0xff]   ;;  %v3551_v58 = vld [vmem:[%s5074_s3 + $0x98] sm:$0xff]  }
 0x1a5   :  { %v571_v1 = vpop.permute.xlu0 %570  ;;  %v786_v4 = vrot.slane %v4307_v29, 5 }
 0x1a6   :  { %v4319_v5 = vsel %vm417_vm3, %v547_v61, %v571_v1 }
 0x1a7   :  { %v789_v7 = vrot.slane %v4319_v5, 5  ;;  %v607_v9 = vpop.permute.xlu1 %606  ;;  %v787_v18 = vsel %vm468_vm5, %v785_v11, %v786_v4  ;;  %v1695_v50 = vrot.slane %v4319_v5, 7  ;;  %v3553_v4 = vld [vmem:[%s5074_s3 + $0x18] sm:$0xff]  }
 0x1a8   :  { %v656_v12 = vsel %vm417_vm3, %v583_v8, %v607_v9  ;;  %v3554_v8 = vld [vmem:[%s5074_s3 + $0xa0] sm:$0xff]  }
 0x1a9   :  { %v605_v13 = vpop.permute.xlu0 %604  ;;  %v790_v16 = vsel %vm468_vm5, %v788_v6, %v789_v7  ;;  %v792_v19 = vrot.slane %v656_v12, 5  ;;  %v1371_v28 = vrot.slane %v656_v12, 2  ;;  %v1698_v43 = vrot.slane %v656_v12, 7  ;;  %v3555_v9 = vld [vmem:[%s5074_s3 + $0x60] sm:$0xff]  }
 0x1aa   :  { %v4332_v17 = vsel %vm417_vm3, %v581_v21, %v605_v13  ;;  %1003 = vmatprep.mubr.bf16.mxu1 %v790_v16  ;;  %v3557_v21 = vld [vmem:[%s5074_s3 + $0xa8] sm:$0xff]  }
 0x1ab   :  { %v791_v20 = vrot.slane %v4332_v17, 5  ;;  %1004 = vmatmul.mubr.bf16.vlgmr.msra.gmra.mrb[0].mxu1 %v787_v18  ;;  %v3558_v13 = vld [vmem:[%s5074_s3 + $0x68] sm:$0xff]   ;;  %v3560_v18 = vld [vmem:[%s5074_s3 + $0xb0] sm:$0xff]  }
 0x1ac   :  { %1266 = vmatpush1.bf16.msra.mxu1 %v3542_v52  ;;  %3112 = vmatprep.mubr.msk.bf16.mxu1 %vm417_vm3, %v4197_v41  ;;  %v549_v41 = vsel %vm466_vm4, %v546_v59, %v548_v15  ;;  %v3549_v15 = vld [vmem:[%s5074_s3 + $0x50] sm:$0xff]   ;;  %v3559_v16 = vld [vmem:[%s5074_s3 + $0x28] sm:$0xff]  }
 0x1ad   :  { %v793_v30 = vsel %vm468_vm5, %v791_v20, %v792_v19  ;;  %1267 = vmatprep.subr.bf16.mxu1 %v3716_v45  ;;  %v3561_v19 = vld [vmem:[%s5074_s3 + $0x70] sm:$0xff]  }
 0x1ae   :  { %1045 = vmatmul.mubr.bf16.vlgmr.msra.gmra.mrb[36].mxu0 %v793_v30  ;;  %v3562_v20 = vld [vmem:[%s5074_s3 + $0x30] sm:$0xff]   ;;  %v3567_v30 = vld [vmem:[%s5074_s3 + $0x200] sm:$0xff]  }
 0x1af   :  { %3284 = vmatpush3.bf16.msra.mxu0 %v3544_v23  ;;  %v609_v32 = vpop.permute.xlu0 %608  ;;  %1256 = vmatprep.mubr.bf16.mxu0 %v636_v62  ;;  %v573_v33 = vpop.permute.xlu1 %572  ;;  %v3563_v23 = vld [vmem:[%s5074_s3 + $0xb8] sm:$0xff]  }
 0x1b0   :  { %v659_v35 = vsel %vm417_vm3, %v585_v31, %v609_v32  ;;  %1268 = vmatpush1.bf16.msra.mxu1 %v3545_v25  ;;  %v4359_v39 = vsel %vm417_vm3, %v549_v41, %v573_v33  ;;  %3285 = vmatprep.subr.bf16.mxu0 %v3546_v26  ;;  %v3565_v25 = vld [vmem:[%s5074_s3 + $0x38] sm:$0xff]   ;;  %v3566_v26 = vld [vmem:[%s5074_s3 + $0xc0] sm:$0xff]   ;;  %v1368_v41 = vrot.slane %v4319_v5, 2  ;;  %v3569_v33 = vld [vmem:[%s5074_s3 + $0xc8] sm:$0xff]  }
 0x1b1   :  { %v1372_v46 = vrot.slane %v659_v35, 2  ;;  %v1699_v48 = vrot.slane %v659_v35, 7  ;;  %1269 = vmatprep.subr.bf16.mxu1 %v3716_v45  ;;  %v1696_v51 = vrot.slane %v4359_v39, 7  ;;  %v2028_v61 = vrot.slane %v659_v35, 4  ;;  %v3568_v32 = vld [vmem:[%s5074_s3 + $0x1c0] sm:$0xff]   ;;  %v3571_v5 = vld [vmem:[%s5074_s3 + $0x1c8] sm:$0xff]  }
 0x1b2   :  { %v2025_v11 = vrot.slane %v4359_v39, 4  ;;  %v1369_v31 = vrot.slane %v4359_v39, 2  ;;  %v3572_v39 = vld [vmem:[%s5074_s3 + $0xd0] sm:$0xff]  }
 0x1b3   :  { %3286 = vmatpush3.bf16.msra.mxu0 %v3547_v34  ;;  %v4370_v42 = vpop.permute.xlu0 %532  ;;  %v611_v54 = vpop.permute.xlu1 %610  ;;  %v4378_v56 = vsel %vm470_vm6, %v1371_v28, %v1372_v46  ;;  %v4381_v59 = vsel %vm283_vm1, %v1698_v43, %v1699_v48  ;;  %v4393_v62 = vsel %vm283_vm1, %v1695_v50, %v1696_v51  ;;  %v3570_v34 = vld [vmem:[%s5074_s3 + $0x208] sm:$0xff]   ;;  %v3576_v28 = vld [vmem:[%s5074_s3 + $0x218] sm:$0xff]   ;;  %v3578_v46 = vld [vmem:[%s5074_s3 + $0x240] sm:$0xff]  }
 0x1b4   :  { %1270 = vmatpush1.bf16.msra.mxu1 %v3548_v40  ;;  %v4384_v57 = vsel %vm417_vm3, %v586_v49, %v611_v54  ;;  %3287 = vmatprep.subr.bf16.mxu0 %v3549_v15  ;;  %v1370_v35 = vsel %vm470_vm6, %v1368_v41, %v1369_v31  ;;  %v3573_v40 = vld [vmem:[%s5074_s3 + $0x210] sm:$0xff]   ;;  %v3575_v15 = vld [vmem:[%s5074_s3 + $0xd8] sm:$0xff]   ;;  %v3579_v48 = vld [vmem:[%s5074_s3 + $0x220] sm:$0xff]  }
 0x1b5   :  { %v2029_v1 = vrot.slane %v4384_v57, 4  ;;  %1271 = vmatprep.subr.bf16.mxu1 %v3716_v45  ;;  %v3577_v43 = vld [vmem:[%s5074_s3 + $0x1d8] sm:$0xff]   ;;  %v3580_v50 = vld [vmem:[%s5074_s3 + $0x1e0] sm:$0xff]   ;;  %v3581_v51 = vld [vmem:[%s5074_s3 + $0x248] sm:$0xff]  }
 0x1b6   :  { %v3582_v49 = vld [vmem:[%s5074_s3 + $0x228] sm:$0xff]   ;;  %v3585_v54 = vld [vmem:[%s5074_s3 + $0x230] sm:$0xff]   ;;  %v3602_v31 = vld [vmem:[%s5074_s3 + $0x280] sm:$0xff]  }
 0x1b7   :  { %3288 = vmatpush3.bf16.msra.mxu0 %v3550_v55  ;;  %v575_v2 = vpop.permute.xlu0 %574  ;;  %v4401_v6 = vsel %vm479_vm10, %v2028_v61, %v2029_v1  ;;  %v3586_v55 = vld [vmem:[%s5074_s3 + $0x1f0] sm:$0xff]   ;;  %v4539_v61 = vsel %vm417_vm3, %v4176_v36, %v4370_v42  ;;  %v3589_v1 = vld [vmem:[%s5074_s3 + $0x1f8] sm:$0xff]   ;;  %v1365_v36 = vrot.slane %v4307_v29, 2  ;;  %v3592_v42 = vld [vmem:[%s5074_s3 + $0x2a0] sm:$0xff]  }
 0x1b8   :  { %v4405_v7 = vsel %vm417_vm3, %v4256_v27, %v575_v2  ;;  %1272 = vmatpush1.bf16.msra.mxu1 %v3551_v58  ;;  %3289 = vmatprep.subr.bf16.mxu0 %v3552_v60  ;;  %v3556_v27 = vld [vmem:[%s5074_s3 + $0x20] sm:$0xff]   ;;  %v3587_v58 = vld [vmem:[%s5074_s3 + $0x258] sm:$0xff]  }
 0x1b9   :  { %v2026_v12 = vrot.slane %v4405_v7, 4  ;;  %1273 = vmatprep.subr.bf16.mxu1 %v3716_v45  ;;  %v3588_v60 = vld [vmem:[%s5074_s3 + $0x238] sm:$0xff]   ;;  %v3590_v2 = vld [vmem:[%s5074_s3 + $0x260] sm:$0xff]  }
 0x1bb   :  { %3290 = vmatpush3.bf16.msra.mxu0 %v3553_v4  ;;  %v4420_v52 = vsel %vm479_vm10, %v2025_v11, %v2026_v12  ;;  %v3591_v4 = vld [vmem:[%s5074_s3 + $0x2e0] sm:$0xff]   ;;  %v3594_v11 = vld [vmem:[%s5074_s3 + $0x2e8] sm:$0xff]  }
 0x1bc   :  { %1274 = vmatpush1.bf16.msra.mxu1 %v3554_v8  ;;  %3291 = vmatprep.subr.bf16.mxu0 %v3555_v9  ;;  %v1366_v8 = vrot.slane %v4539_v61, 2  ;;  %v3593_v9 = vld [vmem:[%s5074_s3 + $0x268] sm:$0xff]  }
 0x1bd   :  { %1275 = vmatprep.subr.bf16.mxu1 %v3716_v45 }
 0x1be   :  { %v1367_v12 = vsel %vm470_vm6, %v1365_v36, %v1366_v8  ;;  %v3613_v8 = vld [vmem:[%s5074_s3 + $0x2d8] sm:$0xff]   ;;  %v3614_v36 = vld [vmem:[%s5074_s3 + $0x320] sm:$0xff]  }
 0x1bf   :  { %3292 = vmatpush3.bf16.msra.mxu0 %v3556_v27  ;;  %v3595_v27 = vld [vmem:[%s5074_s3 + $0x2a8] sm:$0xff]  }
 0x1c0   :  { %1276 = vmatpush1.bf16.msra.mxu1 %v3557_v21  ;;  %3293 = vmatprep.subr.bf16.mxu0 %v3558_v13  ;;  %v3596_v21 = vld [vmem:[%s5074_s3 + $0x270] sm:$0xff]  }
 0x1c1   :  { %1277 = vmatprep.subr.bf16.mxu1 %v3716_v45  ;;  %v3597_v13 = vld [vmem:[%s5074_s3 + $0x2f0] sm:$0xff]  }
 0x1c3   :  { %3294 = vmatpush3.bf16.msra.mxu0 %v3559_v16  ;;  %v3599_v16 = vld [vmem:[%s5074_s3 + $0x278] sm:$0xff]  }
 0x1c4   :  { %1278 = vmatpush1.bf16.msra.mxu1 %v3560_v18  ;;  %3295 = vmatprep.subr.bf16.mxu0 %v3561_v19  ;;  %v3600_v18 = vld [vmem:[%s5074_s3 + $0x2f8] sm:$0xff]   ;;  %v387_v19 = vpop.f32.mrb[24].mxu0 }
 0x1c5   :  { %1279 = vmatprep.subr.bf16.mxu1 %v3716_v45 }
 0x1c7   :  { %3296 = vmatpush3.bf16.msra.mxu0 %v3562_v20  ;;  %v388_v20 = vadd.f32 %v387_v19, %v3955_v63  ;;  %v3626_v19 = vld [vmem:[%s5074_s3 + $0x340] sm:$0xff]  }
 0x1c8   :  { %1280 = vmatpush1.bf16.msra.mxu1 %v3563_v23  ;;  %3297 = vmatprep.subr.bf16.mxu0 %v3564_v24  ;;  %v389_v23 = vpop.f32.mrb[25].mxu0 }
 0x1c9   :  { %1281 = vmatprep.subr.bf16.mxu1 %v3716_v45  ;;  %v390_v24 = vadd.f32 %v389_v23, %v3957_v0  ;;  %441 = vst [vmem:[%s5076_s7 + $0xc0] sm:$0xff] %v388_v20  ;;  %v3627_v20 = vld [vmem:[%s5074_s3 + $0x3e0] sm:$0xff]  }
 0x1ca   :  { %v3628_v23 = vld [vmem:[%s5074_s3 + $0x3a0] sm:$0xff]  }
 0x1cb   :  { %3298 = vmatpush3.bf16.msra.mxu0 %v3565_v25  ;;  %v391_v25 = vpop.f32.mrb[26].mxu0  ;;  %442 = vst.msk [vmem:[%s5076_s7 + $0xc8] sm:$0xff] %vm417_vm3, %v390_v24  ;;  %v3629_v24 = vld [vmem:[%s5074_s3 + $0x348] sm:$0xff]  }
 0x1cc   :  { %1282 = vmatpush1.bf16.msra.mxu1 %v3566_v26  ;;  %3305 = vmatprep.subr.bf16.mxu0 %v3567_v30  ;;  %v3601_v26 = vld [vmem:[%s5074_s3 + $0x2b8] sm:$0xff]   ;;  %v392_v30 = vadd.f32 %v391_v25, %v3955_v63  ;;  %v393_v41 = vpop.f32.mrb[27].mxu0  ;;  %v3630_v25 = vld [vmem:[%s5074_s3 + $0x3e8] sm:$0xff]  }
 0x1cd   :  { %1283 = vmatprep.subr.bf16.mxu1 %v3716_v45 }
 0x1ce   :  { %1257 = vmatmul.mubr.bf16.vlgmr.msra.gmra.mrb[40].mxu0 %v4310_v44  ;;  %v3574_v44 = vld [vmem:[%s5074_s3 + $0x1d0] sm:$0xff]   ;;  %443 = vst [vmem:[%s5076_s7 + $0xd0] sm:$0xff] %v392_v30 }
 0x1cf   :  { %3306 = vmatpush3.bf16.msra.mxu0 %v3568_v32  ;;  %1583 = vmatprep.mubr.bf16.mxu0 %v1370_v35  ;;  %v3603_v32 = vld [vmem:[%s5074_s3 + $0x300] sm:$0xff]   ;;  %v3632_v30 = vld [vmem:[%s5074_s3 + $0x350] sm:$0xff]  }
 0x1d0   :  { %1284 = vmatpush1.bf16.msra.mxu1 %v3569_v33  ;;  %3307 = vmatprep.subr.bf16.mxu0 %v3570_v34  ;;  %v394_v33 = vadd.f32 %v393_v41, %v3957_v0  ;;  %v397_v34 = vpop.f32.mrb[28].mxu0  ;;  %v3634_v41 = vld [vmem:[%s5074_s3 + $0x3b0] sm:$0xff]  }
 0x1d1   :  { %1285 = vmatprep.subr.bf16.mxu1 %v3716_v45  ;;  %v398_v35 = vadd.f32 %v397_v34, %v3955_v63  ;;  %v3636_v34 = vld [vmem:[%s5074_s3 + $0x3f8] sm:$0xff]  }
 0x1d2   :  { %444 = vst.msk [vmem:[%s5076_s7 + $0xd8] sm:$0xff] %vm417_vm3, %v394_v33  ;;  %v3635_v33 = vld [vmem:[%s5074_s3 + $0x358] sm:$0xff]  }
 0x1d3   :  { %3308 = vmatpush3.bf16.msra.mxu0 %v3571_v5  ;;  %v399_v5 = vpop.f32.mrb[29].mxu0  ;;  %445 = vst [vmem:[%s5076_s7 + $0xe0] sm:$0xff] %v398_v35 }
 0x1d4   :  { %1286 = vmatpush1.bf16.msra.mxu1 %v3572_v39  ;;  %3309 = vmatprep.subr.bf16.mxu0 %v3573_v40  ;;  %v3604_v39 = vld [vmem:[%s5074_s3 + $0x2c0] sm:$0xff]   ;;  %v400_v40 = vadd.f32 %v399_v5, %v3957_v0  ;;  %v3637_v5 = vld [vmem:[%s5074_s3 + $0x3b8] sm:$0xff]  }
 0x1d5   :  { %1287 = vmatprep.subr.bf16.mxu1 %v3716_v45 }
 0x1d6   :  { %446 = vst.msk [vmem:[%s5076_s7 + $0xe8] sm:$0xff] %vm417_vm3, %v400_v40  ;;  %v3639_v40 = vld [vmem:[%s5074_s3 + $0x4a0] sm:$0xff]  }
 0x1d7   :  { %3310 = vmatpush3.bf16.msra.mxu0 %v3574_v44  ;;  %v401_v44 = vpop.f32.mrb[30].mxu0 }
 0x1d8   :  { %1288 = vmatpush1.bf16.msra.mxu1 %v3575_v15  ;;  %3311 = vmatprep.subr.bf16.mxu0 %v3576_v28  ;;  %v3605_v15 = vld [vmem:[%s5074_s3 + $0x288] sm:$0xff]  }
 0x1d9   :  { %1592 = vmatprep.subr.bf16.mxu1 %v3716_v45  ;;  %v3606_v28 = vld [vmem:[%s5074_s3 + $0x308] sm:$0xff]  }
 0x1db   :  { %1298 = vmatmul.mubr.bf16.vlgmr.msra.gmra.mrb[4].mxu1 %v4332_v17  ;;  %3312 = vmatpush3.bf16.msra.mxu0 %v3577_v43  ;;  %v3583_v17 = vld [vmem:[%s5074_s3 + $0x1e8] sm:$0xff]   ;;  %v402_v43 = vadd.f32 %v401_v44, %v3955_v63 }
 0x1dc   :  { %1593 = vmatpush1.bf16.msra.mxu1 %v3578_v46  ;;  %3141 = vmatprep.mubr.msk.bf16.mxu1 %vm417_vm3, %v4264_v37  ;;  %v3584_v37 = vld [vmem:[%s5074_s3 + $0x250] sm:$0xff]   ;;  %v403_v46 = vpop.f32.mrb[31].mxu0 }
 0x1dd   :  { %3313 = vmatprep.subr.bf16.mxu0 %v3579_v48  ;;  %1594 = vmatprep.subr.bf16.mxu1 %v3716_v45  ;;  %v404_v48 = vadd.f32 %v403_v46, %v3957_v0  ;;  %447 = vst [vmem:[%s5076_s7 + $0xf0] sm:$0xff] %v402_v43  ;;  %v3642_v43 = vld [vmem:[%s5074_s3 + $0x4a8] sm:$0xff]  }
 0x1df   :  { %3314 = vmatpush3.bf16.msra.mxu0 %v3580_v50  ;;  %v407_v50 = vpop.f32.mrb[32].mxu0  ;;  %448 = vst.msk [vmem:[%s5076_s7 + $0xf8] sm:$0xff] %vm417_vm3, %v404_v48  ;;  %v3643_v48 = vld [vmem:[%s5074_s3 + $0x468] sm:$0xff]  }
 0x1e0   :  { %1595 = vmatpush1.bf16.msra.mxu1 %v3581_v51  ;;  %3315 = vmatprep.subr.bf16.mxu0 %v3582_v49  ;;  %v408_v51 = vadd.f32 %v407_v50, %v3955_v63  ;;  %v409_v49 = vpop.f32.mrb[33].mxu0  ;;  %v3644_v50 = vld [vmem:[%s5074_s3 + $0x370] sm:$0xff]  }
 0x1e1   :  { %1596 = vmatprep.subr.bf16.mxu1 %v3716_v45 }
 0x1e2   :  { %449 = vst [vmem:[%s5076_s7 + $0x100] sm:$0xff] %v408_v51  ;;  %v3645_v51 = vld [vmem:[%s5074_s3 + $0x4b0] sm:$0xff]  }
 0x1e3   :  { %3316 = vmatpush3.bf16.msra.mxu0 %v3583_v17  ;;  %v3607_v17 = vld [vmem:[%s5074_s3 + $0x2c8] sm:$0xff]  }
 0x1e4   :  { %1597 = vmatpush1.bf16.msra.mxu1 %v3584_v37  ;;  %3317 = vmatprep.subr.bf16.mxu0 %v3585_v54  ;;  %v410_v37 = vadd.f32 %v409_v49, %v3957_v0  ;;  %v411_v54 = vpop.f32.mrb[34].mxu0  ;;  %v3646_v49 = vld [vmem:[%s5074_s3 + $0x470] sm:$0xff]  }
 0x1e5   :  { %1598 = vmatprep.subr.bf16.mxu1 %v3716_v45 }
 0x1e6   :  { %450 = vst.msk [vmem:[%s5076_s7 + $0x108] sm:$0xff] %vm417_vm3, %v410_v37  ;;  %v3648_v37 = vld [vmem:[%s5074_s3 + $0x4b8] sm:$0xff]  }
 0x1e7   :  { %3318 = vmatpush3.bf16.msra.mxu0 %v3586_v55  ;;  %v3608_v55 = vld [vmem:[%s5074_s3 + $0x290] sm:$0xff]  }
 0x1e8   :  { %1599 = vmatpush1.bf16.msra.mxu1 %v3587_v58  ;;  %3319 = vmatprep.subr.bf16.mxu0 %v3588_v60  ;;  %v3609_v58 = vld [vmem:[%s5074_s3 + $0x310] sm:$0xff]   ;;  %v412_v60 = vadd.f32 %v411_v54, %v3955_v63  ;;  %v3611_v63 = vld [vmem:[%s5074_s3 + $0x298] sm:$0xff]  }
 0x1e9   :  { %1600 = vmatprep.subr.bf16.mxu1 %v3716_v45  ;;  %v3649_v54 = vld [vmem:[%s5074_s3 + $0x478] sm:$0xff]  }
 0x1ea   :  { %451 = vst [vmem:[%s5076_s7 + $0x110] sm:$0xff] %v412_v60  ;;  %v3652_v60 = vld [vmem:[%s5074_s3 + $0x480] sm:$0xff]  }
 0x1eb   :  { %3320 = vmatpush3.bf16.msra.mxu0 %v3589_v1  ;;  %v413_v1 = vpop.f32.mrb[35].mxu0 }
 0x1ec   :  { %1601 = vmatpush1.bf16.msra.mxu1 %v3590_v2  ;;  %3327 = vmatprep.subr.bf16.mxu0 %v3591_v4  ;;  %v414_v2 = vadd.f32 %v413_v1, %v3957_v0  ;;  %v3610_v4 = vld [vmem:[%s5074_s3 + $0x2d0] sm:$0xff]   ;;  %v3612_v0 = vld [vmem:[%s5074_s3 + $0x318] sm:$0xff]   ;;  %v3653_v1 = vld [vmem:[%s5074_s3 + $0x408] sm:$0xff]  }
 0x1ed   :  { %1602 = vmatprep.subr.bf16.mxu1 %v3716_v45 }
 0x1ee   :  { %1584 = vmatmul.mubr.bf16.vlgmr.msra.gmra.mrb[44].mxu0 %v1367_v12  ;;  %452 = vst.msk [vmem:[%s5076_s7 + $0x118] sm:$0xff] %vm417_vm3, %v414_v2  ;;  %v3616_v12 = vld [vmem:[%s5074_s3 + $0x380] sm:$0xff]   ;;  %v3654_v2 = vld [vmem:[%s5074_s3 + $0x4c8] sm:$0xff]  }
 0x1ef   :  { %3328 = vmatpush3.bf16.msra.mxu0 %v3592_v42  ;;  %1910 = vmatprep.mubr.bf16.mxu0 %v4393_v62  ;;  %v3598_v62 = vld [vmem:[%s5074_s3 + $0x2b0] sm:$0xff]   ;;  %v1693_v42 = vrot.slane %v4539_v61, 7 }
 0x1f0   :  { %1603 = vmatpush1.bf16.msra.mxu1 %v3593_v9  ;;  %3329 = vmatprep.subr.bf16.mxu0 %v3594_v11  ;;  %v3615_v9 = vld [vmem:[%s5074_s3 + $0x3c0] sm:$0xff]   ;;  %v1692_v11 = vrot.slane %v4307_v29, 7 }
 0x1f1   :  { %1604 = vmatprep.subr.bf16.mxu1 %v3716_v45 }
 0x1f2   :  { %v1694_v29 = vsel %vm283_vm1, %v1692_v11, %v1693_v42  ;;  %v3662_v11 = vld [vmem:[%s5074_s3 + $0x420] sm:$0xff]  }
 0x1f3   :  { %3330 = vmatpush3.bf16.msra.mxu0 %v3595_v27  ;;  %v3617_v27 = vld [vmem:[%s5074_s3 + $0x328] sm:$0xff]  }
 0x1f4   :  { %1605 = vmatpush1.bf16.msra.mxu1 %v3596_v21  ;;  %3331 = vmatprep.subr.bf16.mxu0 %v3597_v13  ;;  %v3618_v21 = vld [vmem:[%s5074_s3 + $0x3c8] sm:$0xff]   ;;  %v3621_v13 = vld [vmem:[%s5074_s3 + $0x3d0] sm:$0xff]  }
 0x1f5   :  { %1606 = vmatprep.subr.bf16.mxu1 %v3716_v45 }
 0x1f7   :  { %3332 = vmatpush3.bf16.msra.mxu0 %v3598_v62  ;;  %v3623_v62 = vld [vmem:[%s5074_s3 + $0x338] sm:$0xff]  }
 0x1f8   :  { %1607 = vmatpush1.bf16.msra.mxu1 %v3599_v16  ;;  %3333 = vmatprep.subr.bf16.mxu0 %v3600_v18  ;;  %v3624_v16 = vld [vmem:[%s5074_s3 + $0x3d8] sm:$0xff]  }
 0x1f9   :  { %1608 = vmatprep.subr.bf16.mxu1 %v3716_v45  ;;  %v3625_v18 = vld [vmem:[%s5074_s3 + $0x398] sm:$0xff]  }
 0x1fb   :  { %3334 = vmatpush3.bf16.msra.mxu0 %v3601_v26  ;;  %v3631_v26 = vld [vmem:[%s5074_s3 + $0x3a8] sm:$0xff]  }
 0x1fc   :  { %1609 = vmatpush1.bf16.msra.mxu1 %v3602_v31  ;;  %3335 = vmatprep.subr.bf16.mxu0 %v3603_v32  ;;  %v3633_v31 = vld [vmem:[%s5074_s3 + $0x3f0] sm:$0xff]   ;;  %v535_v32 = vpop.permute.xlu1 %534 }
 0x1fd   :  { %1610 = vmatprep.subr.bf16.mxu1 %v3716_v45  ;;  %v4768_v35 = vsel %vm417_vm3, %v4240_v10, %v535_v32  ;;  %v2022_v10 = vrot.slane %v4539_v61, 4  ;;  %v2349_v61 = vrot.slane %v4405_v7, 1  ;;  %v3680_v32 = vld [vmem:[%s5074_s3 + $0x450] sm:$0xff]  }
 0x1fe   :  { %v2023_v44 = vrot.slane %v4768_v35, 4 }
 0x1ff   :  { %3336 = vmatpush3.bf16.msra.mxu0 %v3604_v39  ;;  %v3638_v39 = vld [vmem:[%s5074_s3 + $0x360] sm:$0xff]  }
 0x200   :  { %1611 = vmatpush1.bf16.msra.mxu1 %v3605_v15  ;;  %3337 = vmatprep.subr.bf16.mxu0 %v3606_v28  ;;  %v3640_v15 = vld [vmem:[%s5074_s3 + $0x460] sm:$0xff]   ;;  %v3641_v28 = vld [vmem:[%s5074_s3 + $0x368] sm:$0xff]   ;;  %v2024_v46 = vsel %vm479_vm10, %v2022_v10, %v2023_v44  ;;  %v3685_v44 = vld [vmem:[%s5074_s3 + $0x578] sm:$0xff]  }
 0x201   :  { %1612 = vmatprep.subr.bf16.mxu1 %v3716_v45  ;;  %v3686_v10 = vld [vmem:[%s5074_s3 + $0x4e0] sm:$0xff]  }
 0x203   :  { %3338 = vmatpush3.bf16.msra.mxu0 %v3607_v17  ;;  %v3647_v17 = vld [vmem:[%s5074_s3 + $0x378] sm:$0xff]  }
 0x204   :  { %1613 = vmatpush1.bf16.msra.mxu1 %v3608_v55  ;;  %3339 = vmatprep.subr.bf16.mxu0 %v3609_v58  ;;  %v3650_v55 = vld [vmem:[%s5074_s3 + $0x400] sm:$0xff]  }
 0x205   :  { %1614 = vmatprep.subr.bf16.mxu1 %v3716_v45  ;;  %v3651_v58 = vld [vmem:[%s5074_s3 + $0x4c0] sm:$0xff]  }
 0x207   :  { %3340 = vmatpush3.bf16.msra.mxu0 %v3610_v4  ;;  %v3657_v4 = vld [vmem:[%s5074_s3 + $0x4d0] sm:$0xff]  }
 0x208   :  { %1615 = vmatpush1.bf16.msra.mxu1 %v3611_v63  ;;  %3341 = vmatprep.subr.bf16.mxu0 %v3612_v0  ;;  %v3658_v63 = vld [vmem:[%s5074_s3 + $0x490] sm:$0xff]   ;;  %v577_v0 = vpop.permute.xlu0 %576 }
 0x209   :  { %1919 = vmatprep.subr.bf16.mxu1 %v3716_v45  ;;  %v649_v42 = vsel %vm417_vm3, %v4247_v14, %v577_v0  ;;  %v3664_v14 = vld [vmem:[%s5074_s3 + $0x540] sm:$0xff]   ;;  %v3695_v0 = vld [vmem:[%s5074_s3 + $0x528] sm:$0xff]  }
 0x20b   :  { %1625 = vmatmul.mubr.bf16.vlgmr.msra.gmra.mrb[4].mxu1 %v4378_v56  ;;  %3342 = vmatpush3.bf16.msra.mxu0 %v3613_v8  ;;  %v3620_v56 = vld [vmem:[%s5074_s3 + $0x330] sm:$0xff]   ;;  %v3659_v8 = vld [vmem:[%s5074_s3 + $0x418] sm:$0xff]  }
 0x20c   :  { %1920 = vmatpush1.bf16.msra.mxu1 %v3614_v36  ;;  %3170 = vmatprep.mubr.msk.bf16.mxu1 %vm417_vm3, %v4267_v38  ;;  %v3619_v38 = vld [vmem:[%s5074_s3 + $0x388] sm:$0xff]   ;;  %v3660_v36 = vld [vmem:[%s5074_s3 + $0x4d8] sm:$0xff]  }
 0x20d   :  { %3349 = vmatprep.subr.bf16.mxu0 %v3615_v9  ;;  %1921 = vmatprep.subr.bf16.mxu1 %v3716_v45  ;;  %v3661_v9 = vld [vmem:[%s5074_s3 + $0x498] sm:$0xff]  }
 0x20e   :  { %1911 = vmatmul.mubr.bf16.vlgmr.msra.gmra.mrb[48].mxu0 %v1694_v29  ;;  %v2348_v29 = vrot.slane %v4768_v35, 1 }
 0x20f   :  { %3350 = vmatpush3.bf16.msra.mxu0 %v3616_v12  ;;  %2240 = vmatprep.mubr.bf16.mxu0 %v4420_v52  ;;  %v3622_v52 = vld [vmem:[%s5074_s3 + $0x390] sm:$0xff]   ;;  %v3663_v12 = vld [vmem:[%s5074_s3 + $0x580] sm:$0xff]  }
 0x210   :  { %1922 = vmatpush1.bf16.msra.mxu1 %v3617_v27  ;;  %3351 = vmatprep.subr.bf16.mxu0 %v3618_v21  ;;  %v2674_v27 = vrot.slane %v649_v42, 6  ;;  %v2673_v21 = vrot.slane %v4405_v7, 6  ;;  %v3667_v7 = vld [vmem:[%s5074_s3 + $0x548] sm:$0xff]   ;;  %v3698_v42 = vld [vmem:[%s5074_s3 + $0x5c0] sm:$0xff]  }
 0x211   :  { %1923 = vmatprep.subr.bf16.mxu1 %v3716_v45 }
 0x213   :  { %3352 = vmatpush3.bf16.msra.mxu0 %v3619_v38  ;;  %v3665_v38 = vld [vmem:[%s5074_s3 + $0x428] sm:$0xff]  }
 0x214   :  { %1924 = vmatpush1.bf16.msra.mxu1 %v3620_v56  ;;  %3353 = vmatprep.subr.bf16.mxu0 %v3621_v13  ;;  %v3666_v56 = vld [vmem:[%s5074_s3 + $0x588] sm:$0xff]   ;;  %v2675_v13 = vsel %vm284_vm2, %v2673_v21, %v2674_v27 }
 0x215   :  { %1925 = vmatprep.subr.bf16.mxu1 %v3716_v45 }
 0x217   :  { %3354 = vmatpush3.bf16.msra.mxu0 %v3622_v52  ;;  %v3668_v52 = vld [vmem:[%s5074_s3 + $0x430] sm:$0xff]  }
 0x218   :  { %1926 = vmatpush1.bf16.msra.mxu1 %v3623_v62  ;;  %3355 = vmatprep.subr.bf16.mxu0 %v3624_v16  ;;  %v3669_v62 = vld [vmem:[%s5074_s3 + $0x590] sm:$0xff]  }
 0x219   :  { %1927 = vmatprep.subr.bf16.mxu1 %v3716_v45  ;;  %v3670_v16 = vld [vmem:[%s5074_s3 + $0x550] sm:$0xff]  }
 0x21b   :  { %3356 = vmatpush3.bf16.msra.mxu0 %v3625_v18  ;;  %v3671_v18 = vld [vmem:[%s5074_s3 + $0x438] sm:$0xff]  }
 0x21c   :  { %1928 = vmatpush1.bf16.msra.mxu1 %v3626_v19  ;;  %3357 = vmatprep.subr.bf16.mxu0 %v3627_v20  ;;  %v3672_v19 = vld [vmem:[%s5074_s3 + $0x598] sm:$0xff]  }
 0x21d   :  { %1929 = vmatprep.subr.bf16.mxu1 %v3716_v45  ;;  %v3673_v20 = vld [vmem:[%s5074_s3 + $0x558] sm:$0xff]  }
 0x21f   :  { %3358 = vmatpush3.bf16.msra.mxu0 %v3628_v23  ;;  %v3674_v23 = vld [vmem:[%s5074_s3 + $0x440] sm:$0xff]  }
 0x220   :  { %1930 = vmatpush1.bf16.msra.mxu1 %v3629_v24  ;;  %3359 = vmatprep.subr.bf16.mxu0 %v3630_v25  ;;  %v3675_v24 = vld [vmem:[%s5074_s3 + $0x5a0] sm:$0xff]  }
 0x221   :  { %1931 = vmatprep.subr.bf16.mxu1 %v3716_v45  ;;  %v3676_v25 = vld [vmem:[%s5074_s3 + $0x560] sm:$0xff]  }
 0x223   :  { %3360 = vmatpush3.bf16.msra.mxu0 %v3631_v26  ;;  %v3677_v26 = vld [vmem:[%s5074_s3 + $0x448] sm:$0xff]  }
 0x224   :  { %1932 = vmatpush1.bf16.msra.mxu1 %v3632_v30  ;;  %3361 = vmatprep.subr.bf16.mxu0 %v3633_v31  ;;  %v3678_v30 = vld [vmem:[%s5074_s3 + $0x5a8] sm:$0xff]  }
 0x225   :  { %1933 = vmatprep.subr.bf16.mxu1 %v3716_v45  ;;  %v3679_v31 = vld [vmem:[%s5074_s3 + $0x568] sm:$0xff]  }
 0x227   :  { %3362 = vmatpush3.bf16.msra.mxu0 %v3634_v41  ;;  %v3681_v41 = vld [vmem:[%s5074_s3 + $0x5b0] sm:$0xff]  }
 0x228   :  { %1934 = vmatpush1.bf16.msra.mxu1 %v3635_v33  ;;  %3363 = vmatprep.subr.bf16.mxu0 %v3636_v34  ;;  %v537_v33 = vpop.permute.xlu1 %536  ;;  %v3682_v34 = vld [vmem:[%s5074_s3 + $0x570] sm:$0xff]  }
 0x229   :  { %1935 = vmatprep.subr.bf16.mxu1 %v3716_v45 }
 0x22b   :  { %3364 = vmatpush3.bf16.msra.mxu0 %v3637_v5  ;;  %v3683_v5 = vld [vmem:[%s5074_s3 + $0x458] sm:$0xff]  }
 0x22c   :  { %1936 = vmatpush1.bf16.msra.mxu1 %v3638_v39  ;;  %3371 = vmatprep.subr.bf16.mxu0 %v3639_v40  ;;  %v3684_v39 = vld [vmem:[%s5074_s3 + $0x5b8] sm:$0xff]   ;;  %v633_v40 = vsel %vm417_vm3, 2.0|2.0, %v537_v33 }
 0x22d   :  { %1937 = vmatprep.subr.bf16.mxu1 %v3716_v45  ;;  %v3709_v33 = vld [vmem:[%s5074_s3 + $0x618] sm:$0xff]  }
 0x22e   :  { %2241 = vmatmul.mubr.bf16.vlgmr.msra.gmra.mrb[52].mxu0 %v2024_v46  ;;  %v3687_v46 = vld [vmem:[%s5074_s3 + $0x4e8] sm:$0xff]  }
 0x22f   :  { %3372 = vmatpush3.bf16.msra.mxu0 %v3640_v15  ;;  %2558 = vmatprep.mubr.bf16.mxu0 %v2349_v61  ;;  %v2671_v15 = vrot.slane %v633_v40, 6 }
 0x230   :  { %1938 = vmatpush1.bf16.msra.mxu1 %v3641_v28  ;;  %3373 = vmatprep.subr.bf16.mxu0 %v3642_v43  ;;  %v2351_v28 = vrot.slane %v4274_v47, 1  ;;  %v2670_v43 = vrot.slane %v4768_v35, 6  ;;  %v3688_v47 = vld [vmem:[%s5074_s3 + $0x4f0] sm:$0xff]   ;;  %v3690_v35 = vld [vmem:[%s5074_s3 + $0x500] sm:$0xff]  }
 0x231   :  { %1939 = vmatprep.subr.bf16.mxu1 %v3716_v45 }
 0x232   :  { %v2672_v61 = vsel %vm284_vm2, %v2670_v43, %v2671_v15 }
 0x233   :  { %3374 = vmatpush3.bf16.msra.mxu0 %v3643_v48  ;;  %v3691_v48 = vld [vmem:[%s5074_s3 + $0x508] sm:$0xff]  }
 0x234   :  { %1940 = vmatpush1.bf16.msra.mxu1 %v3644_v50  ;;  %3375 = vmatprep.subr.bf16.mxu0 %v3645_v51 }
 0x235   :  { %1941 = vmatprep.subr.bf16.mxu1 %v3716_v45 }
 0x237   :  { %3376 = vmatpush3.bf16.msra.mxu0 %v3646_v49 }
 0x238   :  { %1942 = vmatpush1.bf16.msra.mxu1 %v3647_v17  ;;  %3377 = vmatprep.subr.bf16.mxu0 %v3648_v37  ;;  %v3692_v37 = vld [vmem:[%s5074_s3 + $0x510] sm:$0xff]  }
 0x239   :  { %2249 = vmatprep.subr.bf16.mxu1 %v3716_v45 }
 0x23b   :  { %1952 = vmatmul.mubr.bf16.vlgmr.msra.gmra.mrb[4].mxu1 %v4381_v59  ;;  %3378 = vmatpush3.bf16.msra.mxu0 %v3649_v54  ;;  %v3655_v59 = vld [vmem:[%s5074_s3 + $0x488] sm:$0xff]  }
 0x23c   :  { %2250 = vmatpush1.bf16.msra.mxu1 %v3650_v55  ;;  %3199 = vmatprep.mubr.msk.bf16.mxu1 %vm417_vm3, %v4286_v53  ;;  %v3656_v53 = vld [vmem:[%s5074_s3 + $0x410] sm:$0xff]  }
 0x23d   :  { %3379 = vmatprep.subr.bf16.mxu0 %v3651_v58  ;;  %2251 = vmatprep.subr.bf16.mxu1 %v3716_v45 }
 0x23f   :  { %3380 = vmatpush3.bf16.msra.mxu0 %v3652_v60 }
 0x240   :  { %2252 = vmatpush1.bf16.msra.mxu1 %v3653_v1  ;;  %3381 = vmatprep.subr.bf16.mxu0 %v3654_v2 }
 0x241   :  { %2253 = vmatprep.subr.bf16.mxu1 %v3716_v45 }
 0x243   :  { %3382 = vmatpush3.bf16.msra.mxu0 %v3655_v59 }
 0x244   :  { %2254 = vmatpush1.bf16.msra.mxu1 %v3656_v53  ;;  %3383 = vmatprep.subr.bf16.mxu0 %v3657_v4  ;;  %v3693_v4 = vld [vmem:[%s5074_s3 + $0x518] sm:$0xff]  }
 0x245   :  { %2255 = vmatprep.subr.bf16.mxu1 %v3716_v45 }
 0x247   :  { %3384 = vmatpush3.bf16.msra.mxu0 %v3658_v63  ;;  %v3694_v63 = vld [vmem:[%s5074_s3 + $0x520] sm:$0xff]  }
 0x248   :  { %2256 = vmatpush1.bf16.msra.mxu1 %v3659_v8  ;;  %3385 = vmatprep.subr.bf16.mxu0 %v3660_v36  ;;  %v3696_v8 = vld [vmem:[%s5074_s3 + $0x530] sm:$0xff]   ;;  %v3697_v36 = vld [vmem:[%s5074_s3 + $0x538] sm:$0xff]  }
 0x249   :  { %2257 = vmatprep.subr.bf16.mxu1 %v3716_v45 }
 0x24b   :  { %3386 = vmatpush3.bf16.msra.mxu0 %v3661_v9  ;;  %v2350_v9 = vrot.slane %v4384_v57, 1 }
 0x24c   :  { %2258 = vmatpush1.bf16.msra.mxu1 %v3662_v11  ;;  %3393 = vmatprep.subr.bf16.mxu0 %v3663_v12  ;;  %v3699_v11 = vld [vmem:[%s5074_s3 + $0x5c8] sm:$0xff]   ;;  %v3700_v12 = vld [vmem:[%s5074_s3 + $0x5d0] sm:$0xff]  }
 0x24d   :  { %2259 = vmatprep.subr.bf16.mxu1 %v3716_v45 }
 0x24e   :  { %2559 = vmatmul.mubr.bf16.vlgmr.msra.gmra.mrb[56].mxu0 %v2348_v29 }
 0x24f   :  { %3394 = vmatpush3.bf16.msra.mxu0 %v3664_v14  ;;  %2888 = vmatprep.mubr.bf16.mxu0 %v2675_v13 }
 0x250   :  { %2260 = vmatpush1.bf16.msra.mxu1 %v3665_v38  ;;  %3395 = vmatprep.subr.bf16.mxu0 %v3666_v56 }
 0x251   :  { %2261 = vmatprep.subr.bf16.mxu1 %v3716_v45 }
 0x253   :  { %3396 = vmatpush3.bf16.msra.mxu0 %v3667_v7 }
 0x254   :  { %2262 = vmatpush1.bf16.msra.mxu1 %v3668_v52  ;;  %3397 = vmatprep.subr.bf16.mxu0 %v3669_v62  ;;  %v3702_v52 = vld [vmem:[%s5074_s3 + $0x5e0] sm:$0xff]   ;;  %v3703_v62 = vld [vmem:[%s5074_s3 + $0x5e8] sm:$0xff]  }
 0x255   :  { %2263 = vmatprep.subr.bf16.mxu1 %v3716_v45 }
 0x257   :  { %3398 = vmatpush3.bf16.msra.mxu0 %v3670_v16  ;;  %v3704_v16 = vld [vmem:[%s5074_s3 + $0x5f0] sm:$0xff]  }
 0x258   :  { %2264 = vmatpush1.bf16.msra.mxu1 %v3671_v18  ;;  %3399 = vmatprep.subr.bf16.mxu0 %v3672_v19  ;;  %v3705_v18 = vld [vmem:[%s5074_s3 + $0x5f8] sm:$0xff]   ;;  %v3706_v19 = vld [vmem:[%s5074_s3 + $0x600] sm:$0xff]  }
 0x259   :  { %2265 = vmatprep.subr.bf16.mxu1 %v3716_v45 }
 0x25b   :  { %3400 = vmatpush3.bf16.msra.mxu0 %v3673_v20  ;;  %v3707_v20 = vld [vmem:[%s5074_s3 + $0x608] sm:$0xff]  }
 0x25c   :  { %2266 = vmatpush1.bf16.msra.mxu1 %v3674_v23  ;;  %3401 = vmatprep.subr.bf16.mxu0 %v3675_v24  ;;  %v613_v23 = vpop.permute.xlu0 %612  ;;  %v3708_v24 = vld [vmem:[%s5074_s3 + $0x610] sm:$0xff]  }
 0x25d   :  { %2267 = vmatprep.subr.bf16.mxu1 %v3716_v45 }
 0x25f   :  { %3402 = vmatpush3.bf16.msra.mxu0 %v3676_v25 }
 0x260   :  { %2268 = vmatpush1.bf16.msra.mxu1 %v3677_v26  ;;  %3403 = vmatprep.subr.bf16.mxu0 %v3678_v30  ;;  %v665_v30 = vsel %vm417_vm3, %v4315_v3, %v613_v23 }
 0x261   :  { %2269 = vmatprep.subr.bf16.mxu1 %v3716_v45 }
 0x263   :  { %3404 = vmatpush3.bf16.msra.mxu0 %v3679_v31 }
 0x264   :  { %2270 = vmatpush1.bf16.msra.mxu1 %v3680_v32  ;;  %3405 = vmatprep.subr.bf16.mxu0 %v3681_v41 }
 0x265   :  { %2271 = vmatprep.subr.bf16.mxu1 %v3716_v45 }
 0x267   :  { %3406 = vmatpush3.bf16.msra.mxu0 %v3682_v34 }
 0x268   :  { %2272 = vmatpush1.bf16.msra.mxu1 %v3683_v5  ;;  %3407 = vmatprep.subr.bf16.mxu0 %v3684_v39  ;;  %v2677_v39 = vrot.slane %v665_v30, 6 }
 0x269   :  { %2567 = vmatprep.subr.bf16.mxu1 %v3716_v45 }
 0x26b   :  { %2282 = vmatmul.mubr.bf16.vlgmr.msra.gmra.mrb[4].mxu1 %v4401_v6  ;;  %3408 = vmatpush3.bf16.msra.mxu0 %v3685_v44  ;;  %v3689_v6 = vld [vmem:[%s5074_s3 + $0x4f8] sm:$0xff]   ;;  %v2676_v44 = vrot.slane %v4384_v57, 6 }
 0x26c   :  { %2568 = vmatpush1.bf16.msra.mxu1 %v3686_v10  ;;  %3228 = vmatprep.mubr.msk.bf16.mxu1 %vm417_vm3, %v2351_v28 }
 0x26d   :  { %2569 = vmatprep.subr.bf16.mxu1 %v3716_v45  ;;  %v2678_v10 = vsel %vm284_vm2, %v2676_v44, %v2677_v39  ;;  %v3259_v44 = vld [vmem:[%s5078_s5] ss:$0 sm:$0xff] }
 0x26e   :  { %2889 = vmatmul.mubr.bf16.vlgmr.msra.gmra.mrb[60].mxu0 %v2672_v61 }
 0x270   :  { %2570 = vmatpush1.bf16.msra.mxu1 %v3687_v46 }
 0x271   :  { %2571 = vmatprep.subr.bf16.mxu1 %v3716_v45 }
 0x274   :  { %2572 = vmatpush1.bf16.msra.mxu1 %v3688_v47 }
 0x275   :  { %2573 = vmatprep.subr.bf16.mxu1 %v3716_v45 }
 0x278   :  { %2574 = vmatpush1.bf16.msra.mxu1 %v3689_v6 }
 0x279   :  { %2575 = vmatprep.subr.bf16.mxu1 %v3716_v45 }
 0x27c   :  { %2576 = vmatpush1.bf16.msra.mxu1 %v3690_v35 }
 0x27d   :  { %2577 = vmatprep.subr.bf16.mxu1 %v3716_v45 }
 0x27e   :  { %v3277_v50 = vpop.f32.mrb[0].mxu1 }
 0x27f   :  { %v3278_v51 = vpop.f32.mrb[1].mxu1 }
 0x280   :  { %v3279_v49 = vadd.f32 %v3278_v51, %v3277_v50  ;;  %2578 = vmatpush1.bf16.msra.mxu1 %v3691_v48  ;;  %v3280_v17 = vpop.f32.mrb[2].mxu1 }
 0x281   :  { %v3281_v54 = vpop.f32.mrb[3].mxu1  ;;  %v1046_v55 = vpop.f32.mrb[36].mxu0  ;;  %2579 = vmatprep.subr.bf16.mxu1 %v3716_v45 }
 0x282   :  { %v3282_v58 = vadd.f32 %v3281_v54, %v3280_v17  ;;  %v1047_v60 = vadd.f32 %v3279_v49, %v1046_v55  ;;  %v1048_v1 = vpop.f32.mrb[37].mxu0 }
 0x283   :  { %v1049_v2 = vpop.f32.mrb[38].mxu0 }
 0x284   :  { %v1050_v59 = vadd.f32 %v3282_v58, %v1049_v2  ;;  %2580 = vmatpush1.bf16.msra.mxu1 %v3692_v37  ;;  %v1051_v53 = vpop.f32.mrb[39].mxu0 }
 0x285   :  { %2581 = vmatprep.subr.bf16.mxu1 %v3716_v45 }
 0x288   :  { %2582 = vmatpush1.bf16.msra.mxu1 %v3693_v4 }
 0x289   :  { %2583 = vmatprep.subr.bf16.mxu1 %v3716_v45 }
 0x28c   :  { %2584 = vmatpush1.bf16.msra.mxu1 %v3694_v63 }
 0x28d   :  { %2585 = vmatprep.subr.bf16.mxu1 %v3716_v45 }
 0x290   :  { %2586 = vmatpush1.bf16.msra.mxu1 %v3695_v0 }
 0x291   :  { %2587 = vmatprep.subr.bf16.mxu1 %v3716_v45 }
 0x294   :  { %2588 = vmatpush1.bf16.msra.mxu1 %v3696_v8 }
 0x295   :  { %2589 = vmatprep.subr.bf16.mxu1 %v3716_v45 }
 0x298   :  { %2590 = vmatpush1.bf16.msra.mxu1 %v3697_v36 }
 0x299   :  { %2897 = vmatprep.subr.bf16.mxu1 %v3716_v45 }
 0x29b   :  { %2600 = vmatmul.mubr.bf16.vlgmr.msra.gmra.mrb[4].mxu1 %v2350_v9 }
 0x29c   :  { %2898 = vmatpush1.bf16.msra.mxu1 %v3698_v42  ;;  %3257 = vmatprep.mubr.msk.bf16.mxu1 %vm417_vm3, %v4289_v22  ;;  %v3701_v22 = vld [vmem:[%s5074_s3 + $0x5d8] sm:$0xff]  }
 0x29d   :  { %2899 = vmatprep.subr.bf16.mxu1 %v3716_v45 }
 0x2a0   :  { %2900 = vmatpush1.bf16.msra.mxu1 %v3699_v11 }
 0x2a1   :  { %v3299_v27 = vpop.f32.mrb[40].mxu0  ;;  %2901 = vmatprep.subr.bf16.mxu1 %v3716_v45 }
 0x2a2   :  { %v3300_v14 = vpop.f32.mrb[41].mxu0 }
 0x2a3   :  { %v3301_v21 = vadd.f32 %v3300_v14, %v3299_v27  ;;  %v3302_v29 = vpop.f32.mrb[42].mxu0 }
 0x2a4   :  { %v3303_v38 = vpop.f32.mrb[43].mxu0  ;;  %2902 = vmatpush1.bf16.msra.mxu1 %v3700_v12 }
 0x2a5   :  { %v1259_v56 = vadd.f32 %v3301_v21, %v1047_v60  ;;  %v3304_v13 = vadd.f32 %v3303_v38, %v3302_v29  ;;  %2903 = vmatprep.subr.bf16.mxu1 %v3716_v45 }
 0x2a7   :  { %v1262_v7 = vadd.f32 %v3304_v13, %v1050_v59 }
 0x2a8   :  { %2904 = vmatpush1.bf16.msra.mxu1 %v3701_v22  ;;  %v3258_v22 = vld [vmem:[%s5077_s4] ss:$0 sm:$0xff] }
 0x2a9   :  { %2905 = vmatprep.subr.bf16.mxu1 %v3716_v45 }
 0x2ac   :  { %2906 = vmatpush1.bf16.msra.mxu1 %v3702_v52 }
 0x2ad   :  { %2907 = vmatprep.subr.bf16.mxu1 %v3716_v45 }
 0x2b0   :  { %2908 = vmatpush1.bf16.msra.mxu1 %v3703_v62 }
 0x2b1   :  { %2909 = vmatprep.subr.bf16.mxu1 %v3716_v45 }
 0x2b4   :  { %2910 = vmatpush1.bf16.msra.mxu1 %v3704_v16 }
 0x2b5   :  { %2911 = vmatprep.subr.bf16.mxu1 %v3716_v45 }
 0x2b8   :  { %2912 = vmatpush1.bf16.msra.mxu1 %v3705_v18 }
 0x2b9   :  { %2913 = vmatprep.subr.bf16.mxu1 %v3716_v45 }
 0x2bc   :  { %2914 = vmatpush1.bf16.msra.mxu1 %v3706_v19 }
 0x2bd   :  { %2915 = vmatprep.subr.bf16.mxu1 %v3716_v45 }
 0x2c0   :  { %2916 = vmatpush1.bf16.msra.mxu1 %v3707_v20 }
 0x2c1   :  { %v3321_v25 = vpop.f32.mrb[44].mxu0  ;;  %2917 = vmatprep.subr.bf16.mxu1 %v3716_v45 }
 0x2c2   :  { %v3322_v26 = vpop.f32.mrb[45].mxu0 }
 0x2c3   :  { %v3323_v31 = vadd.f32 %v3322_v26, %v3321_v25  ;;  %v3324_v32 = vpop.f32.mrb[46].mxu0 }
 0x2c4   :  { %v3325_v41 = vpop.f32.mrb[47].mxu0  ;;  %2918 = vmatpush1.bf16.msra.mxu1 %v3708_v24 }
 0x2c5   :  { %v3417_v34 = vadd.f32 %v3323_v31, %v1259_v56  ;;  %v3326_v5 = vadd.f32 %v3325_v41, %v3324_v32  ;;  %2919 = vmatprep.subr.bf16.mxu1 %v3716_v45 }
 0x2c7   :  { %v3425_v40 = vadd.f32 %v3326_v5, %v1262_v7 }
 0x2c8   :  { %2920 = vmatpush1.bf16.msra.mxu1 %v3709_v33 }
 0x2cb   :  { %2930 = vmatmul.mubr.bf16.vlgmr.msra.gmra.mrb[4].mxu1 %v2678_v10 }
 0x2e1   :  { %v3343_v3 = vpop.f32.mrb[48].mxu0 }
 0x2e2   :  { %v3344_v15 = vpop.f32.mrb[49].mxu0 }
 0x2e3   :  { %v3345_v28 = vadd.f32 %v3344_v15, %v3343_v3  ;;  %v3346_v43 = vpop.f32.mrb[50].mxu0  ;;  %v3260_v3 = vld [vmem:[%s5079_s6] ss:$0 sm:$0xff] }
 0x2e4   :  { %v3347_v46 = vpop.f32.mrb[51].mxu0 }
 0x2e5   :  { %v3418_v61 = vadd.f32 %v3417_v34, %v3345_v28  ;;  %v3348_v47 = vadd.f32 %v3347_v46, %v3346_v43 }
 0x2e7   :  { %v3426_v6 = vadd.f32 %v3425_v40, %v3348_v47 }
 0x301   :  { %v3365_v35 = vpop.f32.mrb[52].mxu0 }
 0x302   :  { %v3366_v48 = vpop.f32.mrb[53].mxu0 }
 0x303   :  { %v3367_v50 = vadd.f32 %v3366_v48, %v3365_v35  ;;  %v3368_v45 = vpop.f32.mrb[54].mxu0 }
 0x304   :  { %v3369_v51 = vpop.f32.mrb[55].mxu0 }
 0x305   :  { %v3419_v49 = vadd.f32 %v3418_v61, %v3367_v50  ;;  %v3370_v17 = vadd.f32 %v3369_v51, %v3368_v45 }
 0x307   :  { %v3427_v57 = vadd.f32 %v3426_v6, %v3370_v17 }
 0x321   :  { %v3387_v37 = vpop.f32.mrb[56].mxu0 }
 0x322   :  { %v3388_v54 = vpop.f32.mrb[57].mxu0 }
 0x323   :  { %v3389_v55 = vadd.f32 %v3388_v54, %v3387_v37  ;;  %v3390_v58 = vpop.f32.mrb[58].mxu0 }
 0x324   :  { %v3391_v60 = vpop.f32.mrb[59].mxu0 }
 0x325   :  { %v3420_v1 = vadd.f32 %v3419_v49, %v3389_v55  ;;  %v3392_v2 = vadd.f32 %v3391_v60, %v3390_v58 }
 0x327   :  { %v3428_v59 = vadd.f32 %v3427_v57, %v3392_v2 }
 0x341   :  { %v3409_v53 = vpop.f32.mrb[60].mxu0 }
 0x342   :  { %v3410_v4 = vpop.f32.mrb[61].mxu0 }
 0x343   :  { %v3411_v63 = vadd.f32 %v3410_v4, %v3409_v53  ;;  %v3412_v0 = vpop.f32.mrb[62].mxu0 }
 0x344   :  { %v3413_v8 = vpop.f32.mrb[63].mxu0 }
 0x345   :  { %v3414_v36 = vadd.f32 %v3413_v8, %v3412_v0  ;;  %v3421_v42 = vadd.f32 %v3420_v1, %v3411_v63 }
 0x347   :  { %v3429_v9 = vadd.f32 %v3428_v59, %v3414_v36 }
 0x39e   :  { %v2931_v11 = vpop.f32.mrb[4].mxu1 }
 0x39f   :  { %v3422_v12 = vadd.f32 %v3421_v42, %v2931_v11  ;;  %v2933_v27 = vpop.f32.mrb[5].mxu1 }
 0x3a0   :  { %v2934_v14 = vpop.f32.mrb[6].mxu1 }
 0x3a1   :  { %v3430_v21 = vadd.f32 %v3429_v9, %v2934_v14  ;;  %v2936_v29 = vpop.f32.mrb[7].mxu1 }
 0x3a3   :  { %v2941_v38 = vrot.slane %v3430_v21, 6 }
 0x3a5   :  { %v2943_v56 = vsel %vm479_vm10, %v3422_v12, %v2941_v38 }
 0x3a6   :  { %v2951_v13 = vadd.f32 %v3258_v22, %v2943_v56 }
 0x3a8   :  { %v2952_v7 = vsel %vm417_vm3, %v2951_v13, 0.0 }
 0x3a9   :  { %v2953_v52 = vrot.slane %v2952_v7, 4 }
 0x3ab   :  { %v2954_v62 = vadd.f32 %v2953_v52, %v2952_v7 }
 0x3ad   :  { %v2955_v16 = vrot.slane %v2954_v62, 2 }
 0x3af   :  { %v2956_v18 = vadd.f32 %v2955_v16, %v2954_v62 }
 0x3b1   :  { %v2957_v19 = vrot.slane %v2956_v18, 1 }
 0x3b3   :  { %v2958_v20 = vadd.f32 %v2957_v19, %v2956_v18 }
 0x3b5   :  { %v2959_v23 = vmul.f32 0.125, %v2958_v20 }
 0x3b7   :  { %v2960_v24 = vsub.f32 %v2951_v13, %v2959_v23 }
 0x3b9   :  { %v2961_v25 = vmul.f32 %v2960_v24, %v2960_v24 }
 0x3bb   :  { %v2962_v26 = vsel %vm417_vm3, %v2961_v25, 0.0 }
 0x3bc   :  { %v2963_v30 = vrot.slane %v2962_v26, 4 }
 0x3be   :  { %v2964_v31 = vadd.f32 %v2963_v30, %v2962_v26 }
 0x3c0   :  { %v2965_v32 = vrot.slane %v2964_v31, 2 }
 0x3c2   :  { %v2966_v41 = vadd.f32 %v2965_v32, %v2964_v31 }
 0x3c4   :  { %v2967_v33 = vrot.slane %v2966_v41, 1 }
 0x3c6   :  { %v2968_v34 = vadd.f32 %v2967_v33, %v2966_v41 }
 0x3c8   :  { %v2969_v5 = vmul.f32 0.125, %v2968_v34 }
 0x3ca   :  { %v2970_v39 = vadd.f32 1e-05, %v2969_v5 }
 0x3cc   :  { %3710 = vrsqrt.f32 %v2970_v39 }
 0x3d6   :  { %v3711_v40 = vpop.eup %3710 }
 0x3d7   :  { %v2972_v10 = vmul.f32 %v3711_v40, %v2960_v24 }
 0x3d9   :  { %v2980_v15 = vmul.f32 %v3259_v44, %v2972_v10 }
 0x3db   :  { %v2988_v28 = vadd.f32 %v3260_v3, %v2980_v15 }
 0x3dd   :  { %3712 = vtanh.f32 %v2988_v28 }
 0x3e7   :  { %v3713_v43 = vpop.eup %3712 }
 0x3e8   :  { %2991 = vrot.lane.b32.xlu1 %v3713_v43, %s3719_s29 }
 0x45a   :  { %v2992_v46 = vpop.permute.xlu1 %2991 }
 0x45b   :  { %v2994_v61 = vsel %vm417_vm3, %v2988_v28, %v2992_v46 }
 0x45c   :  { %2995 = vst [vmem:[%s5080_s9] sm:$0xff] %v2994_v61 }

</bundles_post_ra>
